<compile_context>
chip_gen: v7x
topology: tpu7x:2x2x1
jax: 0.10.0
libtpu: 0.0.40
codegen_flags: <defaults>
</compile_context>

<pallas_src>
import functools
import math

import jax
import jax.numpy as jnp
from jax.experimental import pallas as pl
from jax.experimental.pallas import tpu as pltpu


def _round_up(x, m):
    return (x + m - 1) // m * m


# --------------------------------------------------------------------------- #
# Kernel: one grid step = (column tile n, batch b, sequence tile s).           #
# --------------------------------------------------------------------------- #
def _final_head_vmp_kernel(x_ref, vx_ref,
                           wk_t_ref, wk2_t_ref, vwk_t_ref,
                           wv_t_ref, wv2_t_ref, vwv_t_ref,
                           k_ref, vk_ref, v_ref, vv_ref, *, heads):
    x = x_ref[0]              # (ts, D) in the MXU operand dtype (bf16 OK)
    vx = vx_ref[0]            # (ts, D)
    x2 = x * x                # VALU filler under the MXU

    dot = functools.partial(jnp.dot, preferred_element_type=jnp.float32)

    # key / value projections: mean and variance (f32 MXU accumulation)
    k = dot(x, wk_t_ref[...])
    vk = dot(vx, wk2_t_ref[...]) + dot(x2, vwk_t_ref[...])
    v = dot(x, wv_t_ref[...])
    vv = dot(vx, wv2_t_ref[...]) + dot(x2, vwv_t_ref[...])

    if heads is None:
        # Lane-dense (ts, tn) writes; the head split stays in XLA outside.
        k_ref[0] = k.astype(k_ref.dtype)
        vk_ref[0] = vk.astype(vk_ref.dtype)
        v_ref[0] = v.astype(v_ref.dtype)
        vv_ref[0] = vv.astype(vv_ref.dtype)
    else:
        # Write the (B, h, S, dk) layout directly: per-head, lane-aligned
        # column slabs (dk is a multiple of 128) -> no XLU transpose in the
        # kernel and no post-kernel HBM transpose passes.
        dk = k.shape[-1] // heads
        for i in range(heads):
            cols = slice(i * dk, (i + 1) * dk)
            k_ref[0, i] = k[:, cols].astype(k_ref.dtype)
            vk_ref[0, i] = vk[:, cols].astype(vk_ref.dtype)
            v_ref[0, i] = v[:, cols].astype(v_ref.dtype)
            vv_ref[0, i] = vv[:, cols].astype(vv_ref.dtype)


# --------------------------------------------------------------------------- #
# Tiling / sizing helpers                                                      #
# --------------------------------------------------------------------------- #
def _seq_tiling(S, sublane, cap=512):
    """Pick a sequence tile (multiple of `sublane`) and the padded seq length."""
    cap = max(cap - cap % sublane, sublane)
    if S <= cap:
        ts = _round_up(S, sublane)
        return ts, ts
    for ts in range(cap, sublane - 1, -sublane):
        if S % ts == 0:
            return ts, S
    # No clean divisor: pad S to a tile multiple instead of an untiled block.
    return cap, _round_up(S, cap)


def _choose_tn(D, w_bytes, weight_budget_bytes):
    """Output-column tile for the weights: D if the six single-buffered (D, D)
    blocks fit the budget, else the largest multiple of 128 dividing D."""
    if 6 * D * D * w_bytes <= weight_budget_bytes or D % 128 != 0:
        return D
    max_tn = max((weight_budget_bytes // (6 * D * w_bytes)) // 128 * 128, 128)
    tn = min(max_tn, D)
    while D % tn:
        tn -= 128
    return max(tn, 128)


def _vmem_limit_bytes(ts, D, tn, out_block_cols, in_bytes, w_bytes, out_bytes):
    """Computed VMEM budget: double-buffered x/vx + 4 outputs, weights counted
    double-buffered (conservative, covers the Buffered(1) fallback), headroom,
    capped per generation."""
    io = 2 * 2 * ts * D * in_bytes + 2 * 4 * ts * out_block_cols * out_bytes
    w = 2 * 6 * D * tn * w_bytes
    need = int((io + w) * 1.25) + (4 << 20)
    try:
        phys = pltpu.get_tpu_info().vmem_capacity_bytes
    except Exception:                               # pragma: no cover
        phys = 64 << 20                             # v7x per-TC floor
    cap = max(min(phys - (8 << 20), 100 << 20), 32 << 20)
    return int(min(max(need, 32 << 20), cap))


# --------------------------------------------------------------------------- #
# Wrapper                                                                      #
# --------------------------------------------------------------------------- #
def final_head_vmp(x, var_x, params, *, h,
                   mxu_dtype=None, out_dtype=jnp.float32,
                   seq_tile_cap=512, weight_vmem_budget=48 << 20):
    """FinalHeadVMP forward.  Returns (k, var_k, v, var_v), each (B, h, S, D//h)."""
    B, S, D = x.shape
    assert D % h == 0
    dk = D // h
    wk, vwk, wv, vwv = params            # nn.Linear layout: (D_out, D_in) = (D, D)

    # MXU operand dtype (bf16 => ~2x MXU throughput on v6e/v7x, half the
    # weight VMEM/HBM).  Accumulation stays f32 in the kernel.
    op_dtype = mxu_dtype if mxu_dtype is not None else x.dtype

    # Fuse + pre-transpose the weights once in XLA *in f32*, then cast only
    # the MXU operands (keeps the variance path accurate with bf16 operands).
    f32 = jnp.float32
    wk32, vwk32 = wk.astype(f32), vwk.astype(f32)
    wv32, vwv32 = wv.astype(f32), vwv.astype(f32)
    weights = tuple(w.T.astype(op_dtype) for w in
                    (wk32, wk32 * wk32 + vwk32, vwk32,
                     wv32, wv32 * wv32 + vwv32, vwv32))

    in_bytes = jnp.dtype(op_dtype).itemsize
    w_bytes = in_bytes
    out_bytes = jnp.dtype(out_dtype).itemsize

    # Sequence tiling (+ zero padding for awkward S).
    sublane = 16 if in_bytes < 4 else 8
    ts, S_pad = _seq_tiling(S, sublane, seq_tile_cap)
    # Keep >= 2 grid steps on the (b, s) axes so both v7x TensorCores get work.
    if B * (S_pad // ts) < 2 and ts > sublane and (ts // 2) % sublane == 0:
        ts //= 2

    xp = x.astype(op_dtype)
    vxp = var_x.astype(op_dtype)
    if S_pad != S:
        pad = ((0, 0), (0, S_pad - S), (0, 0))
        xp = jnp.pad(xp, pad)
        vxp = jnp.pad(vxp, pad)

    # Output-column tiling so the six weight blocks stay inside the VMEM
    # budget (matters on v7x: 64 MiB/TC) even for very large D.
    tn = _choose_tn(D, w_bytes, weight_vmem_budget)

    # Output layout: write (B, h, S, dk) straight from the kernel when each
    # head slab is lane-dense (dk % 128 == 0) and the weights are untiled.
    head_layout = (dk % 128 == 0) and (tn == D)

    grid = (D // tn, B, S_pad // ts)     # N-axis outermost: weight slab DMA'd once

    x_spec = pl.BlockSpec((1, ts, D), lambda n, b, s: (b, s, 0))

    def make_w_spec(single_buffered):
        idx = lambda n, b, s: (0, n)
        if single_buffered and hasattr(pl, "Buffered"):
            # Constant per n-slab: fetched once; double-buffering is pure waste.
            return pl.BlockSpec((D, tn), idx, pipeline_mode=pl.Buffered(1))
        return pl.BlockSpec((D, tn), idx)

    if head_layout:
        out_struct = jax.ShapeDtypeStruct((B, h, S_pad, dk), out_dtype)
        out_spec = pl.BlockSpec((1, h, ts, dk), lambda n, b, s: (b, 0, s, 0))
        out_block_cols = D
        kernel = functools.partial(_final_head_vmp_kernel, heads=h)
    else:
        out_struct = jax.ShapeDtypeStruct((B, S_pad, D), out_dtype)
        out_spec = pl.BlockSpec((1, ts, tn), lambda n, b, s: (b, s, n))
        out_block_cols = tn
        kernel = functools.partial(_final_head_vmp_kernel, heads=None)

    vmem_limit = _vmem_limit_bytes(ts, D, tn, out_block_cols,
                                   in_bytes, w_bytes, out_bytes)

    def _run(single_buffered_weights):
        ws = make_w_spec(single_buffered_weights)
        return pl.pallas_call(
            kernel,
            out_shape=(out_struct,) * 4,
            grid_spec=pltpu.PrefetchScalarGridSpec(
                num_scalar_prefetch=0,
                grid=grid,
                in_specs=[x_spec, x_spec, ws, ws, ws, ws, ws, ws],
                out_specs=[out_spec, out_spec, out_spec, out_spec],
            ),
            compiler_params=pltpu.CompilerParams(
                dimension_semantics=("arbitrary", "parallel", "parallel"),
                vmem_limit_bytes=vmem_limit,
            ),
        )(xp, vxp, *weights)

    try:
        k, vk, v, vv = _run(True)
    except Exception:
        # pl.Buffered(1) not accepted by this jax build -> default buffering.
        k, vk, v, vv = _run(False)

    if head_layout:
        if S_pad != S:
            k, vk, v, vv = (t[:, :, :S, :] for t in (k, vk, v, vv))
        return k, vk, v, vv

    # dk < 128 (or column-tiled weights): reshape is free, transpose is the
    # one remaining layout pass, done by XLA outside the kernel.
    def split(t):
        t = t[:, :S, :] if S_pad != S else t
        return t.reshape(B, S, h, dk).transpose(0, 2, 1, 3)

    return split(k), split(vk), split(v), split(vv)


# --------------------------------------------------------------------------- #
# Pure-JAX reference (same semantics)                                          #
# --------------------------------------------------------------------------- #
def _reference(x, var_x, params, *, h):
    B, S, D = x.shape
    dk = D // h
    wk, vwk, wv, vwv = params

    def lin(xm, xv, W, Wv):
        y = xm @ W.T
        vy = xv @ (W * W + Wv).T + (xm * xm) @ Wv.T
        return y, vy

    def split(t):
        return t.reshape(B, S, h, dk).transpose(0, 2, 1, 3)

    k, vk = lin(x, var_x, wk, vwk)
    v, vv = lin(x, var_x, wv, vwv)
    return split(k), split(vk), split(v), split(vv)


# --------------------------------------------------------------------------- #
if __name__ == "__main__":
    var_init = (0.001, 0.01)

    def make_inputs(B, S, D, key):
        k_x, k_vx, k_wk, k_vwk, k_wv, k_vwv = jax.random.split(key, 6)
        x = jax.random.normal(k_x, (B, S, D), dtype=jnp.float32)
        var_x = jnp.abs(jax.random.normal(k_vx, (B, S, D), dtype=jnp.float32)) * 0.01

        def w_init(k):
            return jax.random.normal(k, (D, D), dtype=jnp.float32) / math.sqrt(D)

        def wvar_init(k):
            return jax.random.uniform(k, (D, D), dtype=jnp.float32,
                                      minval=var_init[0], maxval=var_init[1])

        params = (w_init(k_wk), wvar_init(k_vwk), w_init(k_wv), wvar_init(k_vwv))
        return x, var_x, params

    key = jax.random.PRNGKey(0)
    names = ("k", "var_k", "v", "var_v")

    cases = [
        # (B, S, D, H, kwargs, tol)  -- small shapes, each exercises one path
        (2, 8, 32, 4, {}, 1e-4),                                   # flat layout (dk < 128)
        (1, 16, 256, 2, {}, 1e-4),                                 # head layout written in-kernel (dk = 128)
        (2, 12, 32, 4, dict(mxu_dtype=jnp.bfloat16), 5e-2),        # bf16 MXU operands + seq padding
        (2, 8, 256, 4, dict(weight_vmem_budget=768 * 1024), 1e-4), # forced N-tiling of the weights (tn = 128)
    ]

    for idx, (B, S, D, H, kw, tol) in enumerate(cases):
        key, sub = jax.random.split(key)
        x, var_x, params = make_inputs(B, S, D, sub)

        outs = final_head_vmp(x, var_x, params, h=H, **kw)
        jax.block_until_ready(outs)

        refs = _reference(x, var_x, params, h=H)
        for name, o, r in zip(names, outs, refs):
            assert o.shape == (B, H, S, D // H), (idx, name, o.shape)
            assert jnp.allclose(o.astype(jnp.float32), r, atol=tol, rtol=tol), \
                f"case {idx}: mismatch in {name}"

    print("KERNEL_OK")
</pallas_src>

<mosaic_0001>
module attributes {stable_mosaic.version = 11 : i64} {
  func.func @_final_head_vmp_kernel(%arg0: i32, %arg1: i32, %arg2: i32, %arg3: memref<1x8x32xf32, #tpu.memory_space<vmem>>, %arg4: memref<1x8x32xf32, #tpu.memory_space<vmem>>, %arg5: memref<32x32xf32, #tpu.memory_space<vmem>>, %arg6: memref<32x32xf32, #tpu.memory_space<vmem>>, %arg7: memref<32x32xf32, #tpu.memory_space<vmem>>, %arg8: memref<32x32xf32, #tpu.memory_space<vmem>>, %arg9: memref<32x32xf32, #tpu.memory_space<vmem>>, %arg10: memref<32x32xf32, #tpu.memory_space<vmem>>, %arg11: memref<1x8x32xf32, #tpu.memory_space<vmem>>, %arg12: memref<1x8x32xf32, #tpu.memory_space<vmem>>, %arg13: memref<1x8x32xf32, #tpu.memory_space<vmem>>, %arg14: memref<1x8x32xf32, #tpu.memory_space<vmem>>) attributes {dimension_semantics = [#tpu.dimension_semantics<arbitrary>, #tpu.dimension_semantics<parallel>, #tpu.dimension_semantics<parallel>], iteration_bounds = array<i64: 1, 2, 1>, scalar_prefetch = 0 : i64, scratch_operands = 0 : i64, tpu.core_type = #tpu.core_type<tc>, window_params = [{transform_indices = @transform_0, window_bounds = array<i64: 1, 8, 32>}, {transform_indices = @transform_1, window_bounds = array<i64: 1, 8, 32>}, {pipeline_mode = #tpu.pipeline_mode<synchronous>, transform_indices = @transform_2, window_bounds = array<i64: 32, 32>}, {pipeline_mode = #tpu.pipeline_mode<synchronous>, transform_indices = @transform_3, window_bounds = array<i64: 32, 32>}, {pipeline_mode = #tpu.pipeline_mode<synchronous>, transform_indices = @transform_4, window_bounds = array<i64: 32, 32>}, {pipeline_mode = #tpu.pipeline_mode<synchronous>, transform_indices = @transform_5, window_bounds = array<i64: 32, 32>}, {pipeline_mode = #tpu.pipeline_mode<synchronous>, transform_indices = @transform_6, window_bounds = array<i64: 32, 32>}, {pipeline_mode = #tpu.pipeline_mode<synchronous>, transform_indices = @transform_7, window_bounds = array<i64: 32, 32>}, {transform_indices = @transform_8, window_bounds = array<i64: 1, 8, 32>}, {transform_indices = @transform_9, window_bounds = array<i64: 1, 8, 32>}, {transform_indices = @transform_10, window_bounds = array<i64: 1, 8, 32>}, {transform_indices = @transform_11, window_bounds = array<i64: 1, 8, 32>}]} {
    %c0 = arith.constant 0 : index
    %c0_0 = arith.constant 0 : index
    %c0_1 = arith.constant 0 : index
    %0 = vector.load %arg3[%c0, %c0_0, %c0_1] : memref<1x8x32xf32, #tpu.memory_space<vmem>>, vector<1x8x32xf32>
    %1 = vector.shape_cast %0 : vector<1x8x32xf32> to vector<8x32xf32>
    %c0_2 = arith.constant 0 : index
    %c0_3 = arith.constant 0 : index
    %c0_4 = arith.constant 0 : index
    %2 = vector.load %arg4[%c0_2, %c0_3, %c0_4] : memref<1x8x32xf32, #tpu.memory_space<vmem>>, vector<1x8x32xf32>
    %3 = vector.shape_cast %2 : vector<1x8x32xf32> to vector<8x32xf32>
    %4 = arith.mulf %1, %1 : vector<8x32xf32>
    %c0_5 = arith.constant 0 : index
    %c0_6 = arith.constant 0 : index
    %5 = vector.load %arg5[%c0_5, %c0_6] : memref<32x32xf32, #tpu.memory_space<vmem>>, vector<32x32xf32>
    %cst = arith.constant dense<0.000000e+00> : vector<8x32xf32>
    %6 = tpu.matmul %1, %5, %cst {dimension_numbers = #tpu.dot_dimension_numbers<[1], [0], [0], [1], [0, 0, 1, 1], [], []>} : vector<8x32xf32>, vector<32x32xf32>, vector<8x32xf32> -> vector<8x32xf32>
    %c0_7 = arith.constant 0 : index
    %c0_8 = arith.constant 0 : index
    %7 = vector.load %arg6[%c0_7, %c0_8] : memref<32x32xf32, #tpu.memory_space<vmem>>, vector<32x32xf32>
    %cst_9 = arith.constant dense<0.000000e+00> : vector<8x32xf32>
    %8 = tpu.matmul %3, %7, %cst_9 {dimension_numbers = #tpu.dot_dimension_numbers<[1], [0], [0], [1], [0, 0, 1, 1], [], []>} : vector<8x32xf32>, vector<32x32xf32>, vector<8x32xf32> -> vector<8x32xf32>
    %c0_10 = arith.constant 0 : index
    %c0_11 = arith.constant 0 : index
    %9 = vector.load %arg7[%c0_10, %c0_11] : memref<32x32xf32, #tpu.memory_space<vmem>>, vector<32x32xf32>
    %cst_12 = arith.constant dense<0.000000e+00> : vector<8x32xf32>
    %10 = tpu.matmul %4, %9, %cst_12 {dimension_numbers = #tpu.dot_dimension_numbers<[1], [0], [0], [1], [0, 0, 1, 1], [], []>} : vector<8x32xf32>, vector<32x32xf32>, vector<8x32xf32> -> vector<8x32xf32>
    %11 = arith.addf %8, %10 : vector<8x32xf32>
    %c0_13 = arith.constant 0 : index
    %c0_14 = arith.constant 0 : index
    %12 = vector.load %arg8[%c0_13, %c0_14] : memref<32x32xf32, #tpu.memory_space<vmem>>, vector<32x32xf32>
    %cst_15 = arith.constant dense<0.000000e+00> : vector<8x32xf32>
    %13 = tpu.matmul %1, %12, %cst_15 {dimension_numbers = #tpu.dot_dimension_numbers<[1], [0], [0], [1], [0, 0, 1, 1], [], []>} : vector<8x32xf32>, vector<32x32xf32>, vector<8x32xf32> -> vector<8x32xf32>
    %c0_16 = arith.constant 0 : index
    %c0_17 = arith.constant 0 : index
    %14 = vector.load %arg9[%c0_16, %c0_17] : memref<32x32xf32, #tpu.memory_space<vmem>>, vector<32x32xf32>
    %cst_18 = arith.constant dense<0.000000e+00> : vector<8x32xf32>
    %15 = tpu.matmul %3, %14, %cst_18 {dimension_numbers = #tpu.dot_dimension_numbers<[1], [0], [0], [1], [0, 0, 1, 1], [], []>} : vector<8x32xf32>, vector<32x32xf32>, vector<8x32xf32> -> vector<8x32xf32>
    %c0_19 = arith.constant 0 : index
    %c0_20 = arith.constant 0 : index
    %16 = vector.load %arg10[%c0_19, %c0_20] : memref<32x32xf32, #tpu.memory_space<vmem>>, vector<32x32xf32>
    %cst_21 = arith.constant dense<0.000000e+00> : vector<8x32xf32>
    %17 = tpu.matmul %4, %16, %cst_21 {dimension_numbers = #tpu.dot_dimension_numbers<[1], [0], [0], [1], [0, 0, 1, 1], [], []>} : vector<8x32xf32>, vector<32x32xf32>, vector<8x32xf32> -> vector<8x32xf32>
    %18 = arith.addf %15, %17 : vector<8x32xf32>
    %c0_22 = arith.constant 0 : index
    %c0_23 = arith.constant 0 : index
    %c0_24 = arith.constant 0 : index
    %19 = vector.load %arg11[%c0_22, %c0_23, %c0_24] : memref<1x8x32xf32, #tpu.memory_space<vmem>>, vector<1x8x32xf32>
    %20 = vector.shape_cast %19 : vector<1x8x32xf32> to vector<8x32xf32>
    %21 = vector.shape_cast %6 : vector<8x32xf32> to vector<1x8x32xf32>
    tpu.vector_store %arg11[%c0_22, %c0_23, %c0_24], %21 {strides = array<i32>} : memref<1x8x32xf32, #tpu.memory_space<vmem>>, vector<1x8x32xf32>,
    %c0_25 = arith.constant 0 : index
    %c0_26 = arith.constant 0 : index
    %c0_27 = arith.constant 0 : index
    %22 = vector.load %arg12[%c0_25, %c0_26, %c0_27] : memref<1x8x32xf32, #tpu.memory_space<vmem>>, vector<1x8x32xf32>
    %23 = vector.shape_cast %22 : vector<1x8x32xf32> to vector<8x32xf32>
    %24 = vector.shape_cast %11 : vector<8x32xf32> to vector<1x8x32xf32>
    tpu.vector_store %arg12[%c0_25, %c0_26, %c0_27], %24 {strides = array<i32>} : memref<1x8x32xf32, #tpu.memory_space<vmem>>, vector<1x8x32xf32>,
    %c0_28 = arith.constant 0 : index
    %c0_29 = arith.constant 0 : index
    %c0_30 = arith.constant 0 : index
    %25 = vector.load %arg13[%c0_28, %c0_29, %c0_30] : memref<1x8x32xf32, #tpu.memory_space<vmem>>, vector<1x8x32xf32>
    %26 = vector.shape_cast %25 : vector<1x8x32xf32> to vector<8x32xf32>
    %27 = vector.shape_cast %13 : vector<8x32xf32> to vector<1x8x32xf32>
    tpu.vector_store %arg13[%c0_28, %c0_29, %c0_30], %27 {strides = array<i32>} : memref<1x8x32xf32, #tpu.memory_space<vmem>>, vector<1x8x32xf32>,
    %c0_31 = arith.constant 0 : index
    %c0_32 = arith.constant 0 : index
    %c0_33 = arith.constant 0 : index
    %28 = vector.load %arg14[%c0_31, %c0_32, %c0_33] : memref<1x8x32xf32, #tpu.memory_space<vmem>>, vector<1x8x32xf32>
    %29 = vector.shape_cast %28 : vector<1x8x32xf32> to vector<8x32xf32>
    %30 = vector.shape_cast %18 : vector<8x32xf32> to vector<1x8x32xf32>
    tpu.vector_store %arg14[%c0_31, %c0_32, %c0_33], %30 {strides = array<i32>} : memref<1x8x32xf32, #tpu.memory_space<vmem>>, vector<1x8x32xf32>,
    return
  }
  func.func @transform_0(%arg0: i32, %arg1: i32, %arg2: i32) -> (i32, i32, i32) {
    %c0_i32 = arith.constant 0 : i32
    %c0_i32_0 = arith.constant 0 : i32
    return %arg1, %arg2, %c0_i32 : i32, i32, i32
  }
  func.func @transform_1(%arg0: i32, %arg1: i32, %arg2: i32) -> (i32, i32, i32) {
    %c0_i32 = arith.constant 0 : i32
    %c0_i32_0 = arith.constant 0 : i32
    return %arg1, %arg2, %c0_i32 : i32, i32, i32
  }
  func.func @transform_2(%arg0: i32, %arg1: i32, %arg2: i32) -> (i32, i32) {
    %c0_i32 = arith.constant 0 : i32
    %c0_i32_0 = arith.constant 0 : i32
    return %c0_i32, %arg0 : i32, i32
  }
  func.func @transform_3(%arg0: i32, %arg1: i32, %arg2: i32) -> (i32, i32) {
    %c0_i32 = arith.constant 0 : i32
    %c0_i32_0 = arith.constant 0 : i32
    return %c0_i32, %arg0 : i32, i32
  }
  func.func @transform_4(%arg0: i32, %arg1: i32, %arg2: i32) -> (i32, i32) {
    %c0_i32 = arith.constant 0 : i32
    %c0_i32_0 = arith.constant 0 : i32
    return %c0_i32, %arg0 : i32, i32
  }
  func.func @transform_5(%arg0: i32, %arg1: i32, %arg2: i32) -> (i32, i32) {
    %c0_i32 = arith.constant 0 : i32
    %c0_i32_0 = arith.constant 0 : i32
    return %c0_i32, %arg0 : i32, i32
  }
  func.func @transform_6(%arg0: i32, %arg1: i32, %arg2: i32) -> (i32, i32) {
    %c0_i32 = arith.constant 0 : i32
    %c0_i32_0 = arith.constant 0 : i32
    return %c0_i32, %arg0 : i32, i32
  }
  func.func @transform_7(%arg0: i32, %arg1: i32, %arg2: i32) -> (i32, i32) {
    %c0_i32 = arith.constant 0 : i32
    %c0_i32_0 = arith.constant 0 : i32
    return %c0_i32, %arg0 : i32, i32
  }
  func.func @transform_8(%arg0: i32, %arg1: i32, %arg2: i32) -> (i32, i32, i32) {
    %c0_i32 = arith.constant 0 : i32
    return %arg1, %arg2, %arg0 : i32, i32, i32
  }
  func.func @transform_9(%arg0: i32, %arg1: i32, %arg2: i32) -> (i32, i32, i32) {
    %c0_i32 = arith.constant 0 : i32
    return %arg1, %arg2, %arg0 : i32, i32, i32
  }
  func.func @transform_10(%arg0: i32, %arg1: i32, %arg2: i32) -> (i32, i32, i32) {
    %c0_i32 = arith.constant 0 : i32
    return %arg1, %arg2, %arg0 : i32, i32, i32
  }
  func.func @transform_11(%arg0: i32, %arg1: i32, %arg2: i32) -> (i32, i32, i32) {
    %c0_i32 = arith.constant 0 : i32
    return %arg1, %arg2, %arg0 : i32, i32, i32
  }
}

module attributes {stable_mosaic.version = 11 : i64} {
  func.func @_final_head_vmp_kernel(%arg0: i32, %arg1: i32, %arg2: i32, %arg3: memref<1x8x32xf32, #tpu.memory_space<vmem>>, %arg4: memref<1x8x32xf32, #tpu.memory_space<vmem>>, %arg5: memref<32x32xf32, #tpu.memory_space<vmem>>, %arg6: memref<32x32xf32, #tpu.memory_space<vmem>>, %arg7: memref<32x32xf32, #tpu.memory_space<vmem>>, %arg8: memref<32x32xf32, #tpu.memory_space<vmem>>, %arg9: memref<32x32xf32, #tpu.memory_space<vmem>>, %arg10: memref<32x32xf32, #tpu.memory_space<vmem>>, %arg11: memref<1x8x32xf32, #tpu.memory_space<vmem>>, %arg12: memref<1x8x32xf32, #tpu.memory_space<vmem>>, %arg13: memref<1x8x32xf32, #tpu.memory_space<vmem>>, %arg14: memref<1x8x32xf32, #tpu.memory_space<vmem>>) attributes {dimension_semantics = [#tpu.dimension_semantics<arbitrary>, #tpu.dimension_semantics<parallel>, #tpu.dimension_semantics<parallel>], iteration_bounds = array<i64: 1, 2, 1>, scalar_prefetch = 0 : i64, scratch_operands = 0 : i64, tpu.core_type = #tpu.core_type<tc>, window_params = [{transform_indices = @transform_0, window_bounds = array<i64: 1, 8, 32>}, {transform_indices = @transform_1, window_bounds = array<i64: 1, 8, 32>}, {transform_indices = @transform_2, window_bounds = array<i64: 32, 32>}, {transform_indices = @transform_3, window_bounds = array<i64: 32, 32>}, {transform_indices = @transform_4, window_bounds = array<i64: 32, 32>}, {transform_indices = @transform_5, window_bounds = array<i64: 32, 32>}, {transform_indices = @transform_6, window_bounds = array<i64: 32, 32>}, {transform_indices = @transform_7, window_bounds = array<i64: 32, 32>}, {transform_indices = @transform_8, window_bounds = array<i64: 1, 8, 32>}, {transform_indices = @transform_9, window_bounds = array<i64: 1, 8, 32>}, {transform_indices = @transform_10, window_bounds = array<i64: 1, 8, 32>}, {transform_indices = @transform_11, window_bounds = array<i64: 1, 8, 32>}]} {
    %c0 = arith.constant 0 : index
    %c0_0 = arith.constant 0 : index
    %c0_1 = arith.constant 0 : index
    %0 = vector.load %arg3[%c0, %c0_0, %c0_1] : memref<1x8x32xf32, #tpu.memory_space<vmem>>, vector<1x8x32xf32>
    %1 = vector.shape_cast %0 : vector<1x8x32xf32> to vector<8x32xf32>
    %c0_2 = arith.constant 0 : index
    %c0_3 = arith.constant 0 : index
    %c0_4 = arith.constant 0 : index
    %2 = vector.load %arg4[%c0_2, %c0_3, %c0_4] : memref<1x8x32xf32, #tpu.memory_space<vmem>>, vector<1x8x32xf32>
    %3 = vector.shape_cast %2 : vector<1x8x32xf32> to vector<8x32xf32>
    %4 = arith.mulf %1, %1 : vector<8x32xf32>
    %c0_5 = arith.constant 0 : index
    %c0_6 = arith.constant 0 : index
    %5 = vector.load %arg5[%c0_5, %c0_6] : memref<32x32xf32, #tpu.memory_space<vmem>>, vector<32x32xf32>
    %cst = arith.constant dense<0.000000e+00> : vector<8x32xf32>
    %6 = tpu.matmul %1, %5, %cst {dimension_numbers = #tpu.dot_dimension_numbers<[1], [0], [0], [1], [0, 0, 1, 1], [], []>} : vector<8x32xf32>, vector<32x32xf32>, vector<8x32xf32> -> vector<8x32xf32>
    %c0_7 = arith.constant 0 : index
    %c0_8 = arith.constant 0 : index
    %7 = vector.load %arg6[%c0_7, %c0_8] : memref<32x32xf32, #tpu.memory_space<vmem>>, vector<32x32xf32>
    %cst_9 = arith.constant dense<0.000000e+00> : vector<8x32xf32>
    %8 = tpu.matmul %3, %7, %cst_9 {dimension_numbers = #tpu.dot_dimension_numbers<[1], [0], [0], [1], [0, 0, 1, 1], [], []>} : vector<8x32xf32>, vector<32x32xf32>, vector<8x32xf32> -> vector<8x32xf32>
    %c0_10 = arith.constant 0 : index
    %c0_11 = arith.constant 0 : index
    %9 = vector.load %arg7[%c0_10, %c0_11] : memref<32x32xf32, #tpu.memory_space<vmem>>, vector<32x32xf32>
    %cst_12 = arith.constant dense<0.000000e+00> : vector<8x32xf32>
    %10 = tpu.matmul %4, %9, %cst_12 {dimension_numbers = #tpu.dot_dimension_numbers<[1], [0], [0], [1], [0, 0, 1, 1], [], []>} : vector<8x32xf32>, vector<32x32xf32>, vector<8x32xf32> -> vector<8x32xf32>
    %11 = arith.addf %8, %10 : vector<8x32xf32>
    %c0_13 = arith.constant 0 : index
    %c0_14 = arith.constant 0 : index
    %12 = vector.load %arg8[%c0_13, %c0_14] : memref<32x32xf32, #tpu.memory_space<vmem>>, vector<32x32xf32>
    %cst_15 = arith.constant dense<0.000000e+00> : vector<8x32xf32>
    %13 = tpu.matmul %1, %12, %cst_15 {dimension_numbers = #tpu.dot_dimension_numbers<[1], [0], [0], [1], [0, 0, 1, 1], [], []>} : vector<8x32xf32>, vector<32x32xf32>, vector<8x32xf32> -> vector<8x32xf32>
    %c0_16 = arith.constant 0 : index
    %c0_17 = arith.constant 0 : index
    %14 = vector.load %arg9[%c0_16, %c0_17] : memref<32x32xf32, #tpu.memory_space<vmem>>, vector<32x32xf32>
    %cst_18 = arith.constant dense<0.000000e+00> : vector<8x32xf32>
    %15 = tpu.matmul %3, %14, %cst_18 {dimension_numbers = #tpu.dot_dimension_numbers<[1], [0], [0], [1], [0, 0, 1, 1], [], []>} : vector<8x32xf32>, vector<32x32xf32>, vector<8x32xf32> -> vector<8x32xf32>
    %c0_19 = arith.constant 0 : index
    %c0_20 = arith.constant 0 : index
    %16 = vector.load %arg10[%c0_19, %c0_20] : memref<32x32xf32, #tpu.memory_space<vmem>>, vector<32x32xf32>
    %cst_21 = arith.constant dense<0.000000e+00> : vector<8x32xf32>
    %17 = tpu.matmul %4, %16, %cst_21 {dimension_numbers = #tpu.dot_dimension_numbers<[1], [0], [0], [1], [0, 0, 1, 1], [], []>} : vector<8x32xf32>, vector<32x32xf32>, vector<8x32xf32> -> vector<8x32xf32>
    %18 = arith.addf %15, %17 : vector<8x32xf32>
    %c0_22 = arith.constant 0 : index
    %c0_23 = arith.constant 0 : index
    %c0_24 = arith.constant 0 : index
    %19 = vector.load %arg11[%c0_22, %c0_23, %c0_24] : memref<1x8x32xf32, #tpu.memory_space<vmem>>, vector<1x8x32xf32>
    %20 = vector.shape_cast %19 : vector<1x8x32xf32> to vector<8x32xf32>
    %21 = vector.shape_cast %6 : vector<8x32xf32> to vector<1x8x32xf32>
    tpu.vector_store %arg11[%c0_22, %c0_23, %c0_24], %21 {strides = array<i32>} : memref<1x8x32xf32, #tpu.memory_space<vmem>>, vector<1x8x32xf32>,
    %c0_25 = arith.constant 0 : index
    %c0_26 = arith.constant 0 : index
    %c0_27 = arith.constant 0 : index
    %22 = vector.load %arg12[%c0_25, %c0_26, %c0_27] : memref<1x8x32xf32, #tpu.memory_space<vmem>>, vector<1x8x32xf32>
    %23 = vector.shape_cast %22 : vector<1x8x32xf32> to vector<8x32xf32>
    %24 = vector.shape_cast %11 : vector<8x32xf32> to vector<1x8x32xf32>
    tpu.vector_store %arg12[%c0_25, %c0_26, %c0_27], %24 {strides = array<i32>} : memref<1x8x32xf32, #tpu.memory_space<vmem>>, vector<1x8x32xf32>,
    %c0_28 = arith.constant 0 : index
    %c0_29 = arith.constant 0 : index
    %c0_30 = arith.constant 0 : index
    %25 = vector.load %arg13[%c0_28, %c0_29, %c0_30] : memref<1x8x32xf32, #tpu.memory_space<vmem>>, vector<1x8x32xf32>
    %26 = vector.shape_cast %25 : vector<1x8x32xf32> to vector<8x32xf32>
    %27 = vector.shape_cast %13 : vector<8x32xf32> to vector<1x8x32xf32>
    tpu.vector_store %arg13[%c0_28, %c0_29, %c0_30], %27 {strides = array<i32>} : memref<1x8x32xf32, #tpu.memory_space<vmem>>, vector<1x8x32xf32>,
    %c0_31 = arith.constant 0 : index
    %c0_32 = arith.constant 0 : index
    %c0_33 = arith.constant 0 : index
    %28 = vector.load %arg14[%c0_31, %c0_32, %c0_33] : memref<1x8x32xf32, #tpu.memory_space<vmem>>, vector<1x8x32xf32>
    %29 = vector.shape_cast %28 : vector<1x8x32xf32> to vector<8x32xf32>
    %30 = vector.shape_cast %18 : vector<8x32xf32> to vector<1x8x32xf32>
    tpu.vector_store %arg14[%c0_31, %c0_32, %c0_33], %30 {strides = array<i32>} : memref<1x8x32xf32, #tpu.memory_space<vmem>>, vector<1x8x32xf32>,
    return
  }
  func.func @transform_0(%arg0: i32, %arg1: i32, %arg2: i32) -> (i32, i32, i32) {
    %c0_i32 = arith.constant 0 : i32
    %c0_i32_0 = arith.constant 0 : i32
    return %arg1, %arg2, %c0_i32 : i32, i32, i32
  }
  func.func @transform_1(%arg0: i32, %arg1: i32, %arg2: i32) -> (i32, i32, i32) {
    %c0_i32 = arith.constant 0 : i32
    %c0_i32_0 = arith.constant 0 : i32
    return %arg1, %arg2, %c0_i32 : i32, i32, i32
  }
  func.func @transform_2(%arg0: i32, %arg1: i32, %arg2: i32) -> (i32, i32) {
    %c0_i32 = arith.constant 0 : i32
    %c0_i32_0 = arith.constant 0 : i32
    return %c0_i32, %arg0 : i32, i32
  }
  func.func @transform_3(%arg0: i32, %arg1: i32, %arg2: i32) -> (i32, i32) {
    %c0_i32 = arith.constant 0 : i32
    %c0_i32_0 = arith.constant 0 : i32
    return %c0_i32, %arg0 : i32, i32
  }
  func.func @transform_4(%arg0: i32, %arg1: i32, %arg2: i32) -> (i32, i32) {
    %c0_i32 = arith.constant 0 : i32
    %c0_i32_0 = arith.constant 0 : i32
    return %c0_i32, %arg0 : i32, i32
  }
  func.func @transform_5(%arg0: i32, %arg1: i32, %arg2: i32) -> (i32, i32) {
    %c0_i32 = arith.constant 0 : i32
    %c0_i32_0 = arith.constant 0 : i32
    return %c0_i32, %arg0 : i32, i32
  }
  func.func @transform_6(%arg0: i32, %arg1: i32, %arg2: i32) -> (i32, i32) {
    %c0_i32 = arith.constant 0 : i32
    %c0_i32_0 = arith.constant 0 : i32
    return %c0_i32, %arg0 : i32, i32
  }
  func.func @transform_7(%arg0: i32, %arg1: i32, %arg2: i32) -> (i32, i32) {
    %c0_i32 = arith.constant 0 : i32
    %c0_i32_0 = arith.constant 0 : i32
    return %c0_i32, %arg0 : i32, i32
  }
  func.func @transform_8(%arg0: i32, %arg1: i32, %arg2: i32) -> (i32, i32, i32) {
    %c0_i32 = arith.constant 0 : i32
    return %arg1, %arg2, %arg0 : i32, i32, i32
  }
  func.func @transform_9(%arg0: i32, %arg1: i32, %arg2: i32) -> (i32, i32, i32) {
    %c0_i32 = arith.constant 0 : i32
    return %arg1, %arg2, %arg0 : i32, i32, i32
  }
  func.func @transform_10(%arg0: i32, %arg1: i32, %arg2: i32) -> (i32, i32, i32) {
    %c0_i32 = arith.constant 0 : i32
    return %arg1, %arg2, %arg0 : i32, i32, i32
  }
  func.func @transform_11(%arg0: i32, %arg1: i32, %arg2: i32) -> (i32, i32, i32) {
    %c0_i32 = arith.constant 0 : i32
    return %arg1, %arg2, %arg0 : i32, i32, i32
  }
}

</mosaic_0001>

<bundles_post_ra>
// kernel: tpu_custom_call.1
= control target key start
LH: loop header
LB: loop body
LE: loop exit
PB: predicated region body
PF: predicated region fallthrough
CT: control target
= control target key end

     0   :  { %s2818_s0 = inlined_call_operand.hbm [shape: f32[2,8,32], index: 0, kind: input, shape index: {}]   ;;  %s2819_s1 = inlined_call_operand.hbm [shape: f32[2,8,32], index: 1, kind: input, shape index: {}]   ;;  %s2820_s2 = inlined_call_operand.hbm [shape: f32[32,32], index: 2, kind: input, shape index: {}]   ;;  %s2821_s3 = inlined_call_operand.hbm [shape: f32[32,32], index: 3, kind: input, shape index: {}]   ;;  %s2822_s4 = inlined_call_operand.hbm [shape: f32[32,32], index: 4, kind: input, shape index: {}]   ;;  %s2823_s5 = inlined_call_operand.hbm [shape: f32[32,32], index: 5, kind: input, shape index: {}]   ;;  %s2824_s6 = inlined_call_operand.hbm [shape: f32[32,32], index: 6, kind: input, shape index: {}]   ;;  %s2825_s7 = inlined_call_operand.hbm [shape: f32[32,32], index: 7, kind: input, shape index: {}]   ;;  %s2826_s8 = inlined_call_operand.hbm [shape: f32[2,8,32], index: 8, kind: output, shape index: {0}]   ;;  %s2827_s9 = inlined_call_operand.hbm [shape: f32[2,8,32], index: 9, kind: output, shape index: {1}]   ;;  %s2828_s10 = inlined_call_operand.hbm [shape: f32[2,8,32], index: 10, kind: output, shape index: {2}]   ;;  %s2829_s11 = inlined_call_operand.hbm [shape: f32[2,8,32], index: 11, kind: output, shape index: {3}]  }
   0x1   :  { %2841 = sst [smem:[#allocation32_spill]] %s2818_s0 }
   0x2   :  { %2842 = sst [smem:[#allocation33_spill]] %s2819_s1 }
   0x3   :  { %2843 = sst [smem:[#allocation34_spill]] %s2820_s2 }
   0x4   :  { %2844 = sst [smem:[#allocation35_spill]] %s2821_s3 }
   0x5   :  { %2845 = sst [smem:[#allocation36_spill]] %s2822_s4 }
   0x6   :  { %2846 = sst [smem:[#allocation37_spill]] %s2823_s5 }
   0x7   :  { %2847 = sst [smem:[#allocation38_spill]] %s2824_s6 }
   0x8   :  { %2848 = sst [smem:[#allocation39_spill]] %s2826_s8 }
   0x9   :  { %2849 = sst [smem:[#allocation40_spill]] %s2827_s9 }
   0xa   :  { %2850 = sst [smem:[#allocation41_spill]] %s2828_s10 }
   0xb   :  { %2851 = sst [smem:[#allocation42_spill]] %s2829_s11 }
   0xc   :  { %17 = vsyncpa [#allocation3], 0 }
   0xd   :  { %19 = vsyncpa [#allocation3 + $0x1], 0 }
   0xe   :  { %20 = vsyncpa [#allocation6], 0 }
   0xf   :  { %22 = vsyncpa [#allocation6 + $0x1], 0 }
  0x10   :  { %23 = vsyncpa [#allocation9], 0 }
  0x11   :  { %24 = vsyncpa [#allocation12], 0 }
  0x12   :  { %25 = vsyncpa [#allocation15], 0 }
  0x13   :  { %26 = vsyncpa [#allocation4], 0 }
  0x14   :  { %28 = vsyncpa [#allocation4 + $0x1], 0 }
  0x15   :  { %29 = vsyncpa [#allocation18], 0 }
  0x16   :  { %31 = vsyncpa [#allocation18 + $0x1], 0 }
  0x17   :  { %32 = vsyncpa [#allocation21], 0 }
  0x18   :  { %34 = vsyncpa [#allocation21 + $0x1], 0  ;;  %s2278_s17 = smov 0   ;;  %s2280_s18 = smov 0  }
  0x19   :  { %s2282_s19 = smov 0   ;;  %s2284_s20 = smov 0  }
  0x1a   :  { %s2286_s21 = smov 0   ;;  %s2288_s22 = smov 0  }
  0x1b LB: > { %2852 = sst [smem:[#allocation31_spill]] %s2191_s20  ;;  %s2309_s23 = sadd.s32 4294967295, %s2199_s22   ;;  %s2199_s22 = sphi %s2288_s22, %s40_s22   ;;  %s2195_s21 = sphi %s2286_s21, %s2893_s21   ;;  %s2191_s20 = sphi %s2284_s20, %s2892_s20   ;;  %s2187_s19 = sphi %s2282_s19, %s2891_s19   ;;  %s2183_s18 = sphi %s2280_s18, %s2890_s18   ;;  %s2179_s17 = sphi %s2278_s17, %s2889_s17  }
  0x1c   : > { %p1452_p0 = scmp.ge.s32.totalorder %s2199_s22, 1  ;;  %p2834_p1 = scmp.eq.s32.totalorder %s2309_s23, 0 }
  0x1d   : > { %p396_p2 = scmp.lt.s32.totalorder %s2199_s22, 3  ;;  %s2201_s25 = smov [#allocation7]  }
  0x1e   : > { %s410_s26 = sshll.u32 %s2201_s25, 4  ;;  %s2202_s28 = smov [#allocation8]   ;;  %s2318_s26 = int_to_ptr.vmem [resolvable:$true] %s410_s26 }
  0x1f   : > { %p2314_p3 = pnand %p1452_p0, %p396_p2  ;;  %s425_s29 = sshll.u32 %s2202_s28, 4  ;;  %s2329_s29 = int_to_ptr.vmem [resolvable:$true] %s425_s29 }
  0x20   : > { %s2203_s30 = smov [#allocation11]   ;;  %s2855_s2 = sld [smem:[#allocation34_spill]] }
  0x21   : > { %s2853_s24 = scalar_select %p2314_p3, 1, 0 }
  0x22   : > { %p1665_p4 = pneg %p2314_p3  ;;  %s2331_s12 = sshll.u32 %s2203_s30, 4  ;;  %s456_s12 = int_to_ptr.vmem [resolvable:$true] %s2331_s12 }
  0x24   : > { %p2325_p6 = pnand %p1665_p4, %p2834_p1 }
  0x26   : > { %s1777_s15 = scalar_lea.hbm %s2855_s2, 512  ;;  %p2341_p8 = pneg %p2325_p6 }
  0x27   : > { %p1778_p7 = scmp.ne.s32.totalorder %s2855_s2, %s1777_s15  ;;  %p1784_p11 = scmp.lt.u32.totalorder %s1777_s15, %s2855_s2 }
  0x29   : > { %p1780_p9 = pnand %p2341_p8, %p1778_p7 }
  0x2b   : > { %p1781_p10 = pneg %p1780_p9 }
  0x2d   : > { %p1786_p12 = pnand %p1784_p11, %p1781_p10 }
  0x2f   : > { %1789 = shalt.err (!%p1786_p12)
}
  0x30   : > { %s1790_s13 = scalar_lea.vmem %s2318_s26, 512  ;;  %p1798_p4 = scmp.lt.s32.totalorder %s2318_s26, %s2318_s26 }
  0x31   : > { %p1791_p13 = scmp.ne.s32.totalorder %s2318_s26, %s1790_s13  ;;  %p1799_p5 = scmp.lt.s32.totalorder %s1790_s13, %s1790_s13 }
  0x33   : > { %p1793_p0 = pnand %p1791_p13, %p2341_p8  ;;  %p1800_p7 = por %p1799_p5, %p1798_p4 }
  0x35   : > { %p1794_p2 = pneg %p1793_p0 }
  0x37   : > { %p1801_p9 = pnand %p1800_p7, %p1794_p2 }
  0x39   : > { %1804 = shalt.err (!%p1801_p9)
}
  0x3a   : > { %s2204_s14 = smov 128   ;;  %s2205_s15 = smov 8  }
  0x3b   : > { %1668 = dma.hbm_to_vmem [thread:$0]  (!%p2325_p6), %s2855_s2, 512, %s2318_s26, [#allocation6], %s2204_s14, %s2204_s14, %s2205_s15  }
  0x3c   : > { %s2857_s3 = sld [smem:[#allocation35_spill]] }
  0x42   : > { %s1805_s13 = scalar_lea.hbm %s2857_s3, 512 }
  0x43   : > { %p1806_p5 = scmp.ne.s32.totalorder %s2857_s3, %s1805_s13  ;;  %p1812_p12 = scmp.lt.u32.totalorder %s1805_s13, %s2857_s3 }
  0x45   : > { %p1808_p10 = pnand %p1806_p5, %p2341_p8 }
  0x47   : > { %p1809_p11 = pneg %p1808_p10 }
  0x49   : > { %p1814_p13 = pnand %p1812_p12, %p1809_p11 }
  0x4b   : > { %1817 = shalt.err (!%p1814_p13)
}
  0x4c   : > { %s1818_s26 = scalar_lea.vmem %s2329_s29, 512  ;;  %p1826_p7 = scmp.lt.s32.totalorder %s2329_s29, %s2329_s29 }
  0x4d   : > { %p1819_p0 = scmp.ne.s32.totalorder %s2329_s29, %s1818_s26  ;;  %p1827_p9 = scmp.lt.s32.totalorder %s1818_s26, %s1818_s26 }
  0x4f   : > { %p1821_p2 = pnand %p1819_p0, %p2341_p8  ;;  %p1828_p5 = por %p1827_p9, %p1826_p7 }
  0x51   : > { %p1822_p4 = pneg %p1821_p2 }
  0x53   : > { %p1829_p10 = pnand %p1828_p5, %p1822_p4 }
  0x55   : > { %1832 = shalt.err (!%p1829_p10)
}
  0x56   : > { %1671 = dma.hbm_to_vmem [thread:$0]  (!%p2325_p6), %s2857_s3, 512, %s2329_s29, [#allocation9], %s2204_s14, %s2204_s14, %s2205_s15  }
  0x57   : > { %s2858_s5 = sld [smem:[#allocation37_spill]] }
  0x5d   : > { %s1833_s16 = scalar_lea.hbm %s2858_s5, 512 }
  0x5e   : > { %p1834_p11 = scmp.ne.s32.totalorder %s2858_s5, %s1833_s16  ;;  %p1840_p0 = scmp.lt.u32.totalorder %s1833_s16, %s2858_s5 }
  0x60   : > { %p1836_p12 = pnand %p1834_p11, %p2341_p8 }
  0x62   : > { %p1837_p13 = pneg %p1836_p12 }
  0x64   : > { %p1842_p2 = pnand %p1840_p0, %p1837_p13 }
  0x66   : > { %1845 = shalt.err (!%p1842_p2)
}
  0x67   : > { %s1846_s26 = scalar_lea.vmem %s456_s12, 512  ;;  %p1854_p5 = scmp.lt.s32.totalorder %s456_s12, %s456_s12 }
  0x68   : > { %p1847_p4 = scmp.ne.s32.totalorder %s456_s12, %s1846_s26  ;;  %p1855_p10 = scmp.lt.s32.totalorder %s1846_s26, %s1846_s26 }
  0x6a   : > { %p1849_p7 = pnand %p1847_p4, %p2341_p8  ;;  %p1856_p1 = por %p1855_p10, %p1854_p5 }
  0x6c   : > { %p1850_p9 = pneg %p1849_p7 }
  0x6e   : > { %p1857_p3 = pnand %p1856_p1, %p1850_p9 }
  0x70   : > { %1860 = shalt.err (!%p1857_p3)
}
  0x71   : > { %1677 = dma.hbm_to_vmem [thread:$0]  (!%p2325_p6), %s2858_s5, 512, %s456_s12, [#allocation12], %s2204_s14, %s2204_s14, %s2205_s15  }
  0x72   : > { %s2206_s9 = smov [#allocation10]   ;;  %s2207_s20 = smov [#allocation13]  }
  0x73   : > { %s440_s10 = sshll.u32 %s2206_s9, 4  ;;  %s470_s16 = sshll.u32 %s2207_s20, 4  ;;  %s441_s10 = int_to_ptr.vmem [resolvable:$true] %s440_s10  ;;  %s471_s16 = int_to_ptr.vmem [resolvable:$true] %s470_s16 }
  0x74   : > { %s2859_s4 = sld [smem:[#allocation36_spill]] }
  0x7a   : > { %s1861_s30 = scalar_lea.hbm %s2859_s4, 512 }
  0x7b   : > { %p1862_p1 = scmp.ne.s32.totalorder %s2859_s4, %s1861_s30  ;;  %p1868_p12 = scmp.lt.u32.totalorder %s1861_s30, %s2859_s4 }
  0x7d   : > { %p1864_p3 = pnand %p1862_p1, %p2341_p8 }
  0x7f   : > { %p1865_p11 = pneg %p1864_p3 }
  0x81   : > { %p1870_p13 = pnand %p1868_p12, %p1865_p11 }
  0x83   : > { %1873 = shalt.err (!%p1870_p13)
}
  0x84   : > { %s1874_s12 = scalar_lea.vmem %s441_s10, 512  ;;  %p1882_p7 = scmp.lt.s32.totalorder %s441_s10, %s441_s10 }
  0x85   : > { %p1875_p0 = scmp.ne.s32.totalorder %s441_s10, %s1874_s12  ;;  %p1883_p9 = scmp.lt.s32.totalorder %s1874_s12, %s1874_s12 }
  0x87   : > { %p1877_p2 = pnand %p1875_p0, %p2341_p8  ;;  %p1884_p5 = por %p1883_p9, %p1882_p7 }
  0x89   : > { %p1878_p4 = pneg %p1877_p2 }
  0x8b   : > { %p1885_p10 = pnand %p1884_p5, %p1878_p4 }
  0x8d   : > { %1888 = shalt.err (!%p1885_p10)
}
  0x8e   : > { %1674 = dma.hbm_to_vmem [thread:$0]  (!%p2325_p6), %s2859_s4, 512, %s441_s10, [#allocation9], %s2204_s14, %s2204_s14, %s2205_s15  }
  0x8f   : > { %s2860_s6 = sld [smem:[#allocation38_spill]] }
  0x95   : > { %s1889_s25 = scalar_lea.hbm %s2860_s6, 512 }
  0x96   : > { %p1890_p1 = scmp.ne.s32.totalorder %s2860_s6, %s1889_s25  ;;  %p1896_p12 = scmp.lt.u32.totalorder %s1889_s25, %s2860_s6 }
  0x98   : > { %p1892_p3 = pnand %p1890_p1, %p2341_p8 }
  0x9a   : > { %p1893_p11 = pneg %p1892_p3 }
  0x9c   : > { %p1898_p13 = pnand %p1896_p12, %p1893_p11 }
  0x9e   : > { %1901 = shalt.err (!%p1898_p13)
}
  0x9f   : > { %s1902_s29 = scalar_lea.vmem %s471_s16, 512  ;;  %p1910_p7 = scmp.lt.s32.totalorder %s471_s16, %s471_s16 }
  0xa0   : > { %p1903_p0 = scmp.ne.s32.totalorder %s471_s16, %s1902_s29  ;;  %p1911_p9 = scmp.lt.s32.totalorder %s1902_s29, %s1902_s29 }
  0xa2   : > { %p1905_p2 = pnand %p1903_p0, %p2341_p8  ;;  %p1912_p5 = por %p1911_p9, %p1910_p7 }
  0xa4   : > { %p1906_p4 = pneg %p1905_p2 }
  0xa6   : > { %p1913_p10 = pnand %p1912_p5, %p1906_p4 }
  0xa8   : > { %1916 = shalt.err (!%p1913_p10)
}
  0xa9   : > { %1680 = dma.hbm_to_vmem [thread:$0]  (!%p2325_p6), %s2860_s6, 512, %s471_s16, [#allocation12], %s2204_s14, %s2204_s14, %s2205_s15  }
  0xaa   : > { %s2208_s2 = smov [#allocation14]   ;;  %s1917_s25 = scalar_lea.hbm %s2825_s7, 512 }
  0xab   : > { %s485_s8 = sshll.u32 %s2208_s2, 4  ;;  %p1918_p1 = scmp.ne.s32.totalorder %s2825_s7, %s1917_s25  ;;  %s486_s8 = int_to_ptr.vmem [resolvable:$true] %s485_s8 }
  0xac   : > { %p1924_p12 = scmp.lt.u32.totalorder %s1917_s25, %s2825_s7 }
  0xad   : > { %p1920_p3 = pnand %p1918_p1, %p2341_p8 }
  0xaf   : > { %p1921_p11 = pneg %p1920_p3 }
  0xb1   : > { %p1926_p13 = pnand %p1924_p12, %p1921_p11 }
  0xb3   : > { %1929 = shalt.err (!%p1926_p13)
}
  0xb4   : > { %s1930_s16 = scalar_lea.vmem %s486_s8, 512  ;;  %p1938_p7 = scmp.lt.s32.totalorder %s486_s8, %s486_s8 }
  0xb5   : > { %p1931_p0 = scmp.ne.s32.totalorder %s486_s8, %s1930_s16  ;;  %p1939_p9 = scmp.lt.s32.totalorder %s1930_s16, %s1930_s16 }
  0xb7   : > { %p1933_p2 = pnand %p1931_p0, %p2341_p8  ;;  %p1940_p5 = por %p1939_p9, %p1938_p7 }
  0xb9   : > { %p1934_p4 = pneg %p1933_p2 }
  0xbb   : > { %p1941_p10 = pnand %p1940_p5, %p1934_p4 }
  0xbd   : > { %1944 = shalt.err (!%p1941_p10)
}
  0xbe   : > { %1683 = dma.hbm_to_vmem [thread:$0]  (!%p2325_p6), %s2825_s7, 512, %s486_s8, [#allocation15], %s2204_s14, %s2204_s14, %s2205_s15  }
  0xbf   : > { %s2836_s11 = sadd.s32 4294967294, %s2199_s22   ;;  %s55_s27 = sadd.s32 1, %s2195_s21 }
  0xc0   : > { %p57_p8 = scmp.ge.s32.totalorder %s55_s27, 2  ;;  %s68_s12 = sadd.s32 1, %s2187_s19 }
  0xc1   : > { %p75_p1 = scmp.ne.s32.totalorder %s2187_s19, %s2183_s18  ;;  %p76_p3 = scmp.eq.s32.totalorder %s2199_s22, 0 }
  0xc2   : > { %s2895_s27 = smov (%p57_p8, %s55_s27), 0  ;;  %p81_p12 = scmp.ne.s32.totalorder %s2183_s18, %s2179_s17 }
  0xc3   : > { %p2484_p11 = por %p76_p3, %p75_p1  ;;  %s63_s14 = ssub.s32 %s2195_s21, %s2895_s27 }
  0xc4   : > { %p293_p6 = scmp.eq.s32.totalorder %s2309_s23, 1  ;;  %p66_p13 = scmp.eq.s32.totalorder %s63_s14, 0 }
  0xc5   : > { %p2862_p0 = scmp.eq.s32.totalorder %s2309_s23, 0  ;;  %p299_p7 = scmp.eq.s32.totalorder %s2836_s11, 1 }
  0xc6   : > { %p2499_p4 = por %p293_p6, %p75_p1  ;;  %p1710_p5 = scmp.lt.s32.totalorder %s2199_s22, 2 }
  0xc7   : > { %p2495_p2 = por %p2862_p0, %p81_p12  ;;  %p2508_p9 = por %p299_p7, %p81_p12 }
  0xc8   : > { %s2864_s8 = scalar_select %p2499_p4, 1, 0 }
  0xc9   : > { %s2863_s15 = scalar_select %p2495_p2, 1, 0 }
  0xca   : > { %s2506_s9 = scalar_select %p66_p13, %s2187_s19, %s68_s12  }
  0xcb   : > { %s2865_s20 = scalar_select %p2508_p9, 1, 0 }
  0xcc   : > { %s499_s25 = sand.u32 1, %s2187_s19   ;;  %s1461_s28 = sshll.u32 %s2195_s21, 7 }
  0xcd   : > { %s2515_s30 = sshll.u32 %s499_s25, 3  ;;  %s2866_s0 = sld [smem:[#allocation32_spill]] }
  0xce   : > { %s503_s29 = scalar_lea.vmem [#allocation2], %s2515_s30  ;;  %p2525_p10 = pnand %p1710_p5, %p2484_p11 }
  0xcf   : > { %s511_s10 = sshll.u32 %s503_s29, 4  ;;  %s2868_s1 = sld [smem:[#allocation33_spill]]  ;;  %s2529_s10 = int_to_ptr.vmem [resolvable:$true] %s511_s10 }
  0xd0   : > { %s500_s11 = scalar_lea.sflag [#allocation3], %s499_s25  ;;  %p1947_p1 = pneg %p2525_p10 }
  0xd3   : > { %s2520_s16 = scalar_lea.hbm %s2866_s0, %s1461_s28  ;;  %s1950_s4 = scalar_lea.hbm %s2866_s0, 256 }
  0xd4   : > { %s1945_s3 = scalar_lea.hbm %s2520_s16, 128  ;;  %p1951_p12 = scmp.lt.u32.totalorder %s2520_s16, %s2866_s0 }
  0xd5   : > { %s2534_s26 = scalar_lea.hbm %s2868_s1, %s1461_s28  ;;  %p1946_p8 = scmp.ne.s32.totalorder %s2520_s16, %s1945_s3 }
  0xd6   : > { %p1952_p6 = scmp.lt.u32.totalorder %s1950_s4, %s1945_s3  ;;  %p1954_p0 = scmp.lt.u32.totalorder %s1945_s3, %s2520_s16 }
  0xd7   : > { %p1948_p3 = pnand %p1947_p1, %p1946_p8 }
  0xd8   : > { %p1953_p13 = por %p1952_p6, %p1951_p12 }
  0xd9   : > { %p1949_p11 = pneg %p1948_p3 }
  0xda   : > { %p1955_p7 = por %p1954_p0, %p1953_p13 }
  0xdc   : > { %p1956_p5 = pnand %p1955_p7, %p1949_p11 }
  0xde   : > { %1959 = shalt.err (!%p1956_p5)
}
  0xdf   : > { %s1960_s25 = scalar_lea.vmem %s2529_s10, 128  ;;  %s2209_s28 = smov [#allocation2]  }
  0xe0   : > { %p1961_p8 = scmp.ne.s32.totalorder %s2529_s10, %s1960_s25  ;;  %s1965_s14 = sshll.u32 %s2209_s28, 4  ;;  %s1966_s14 = int_to_ptr.vmem [resolvable:$false] %s1965_s14 }
  0xe1   : > { %s1967_s5 = scalar_lea.vmem %s1966_s14, 256  ;;  %p1968_p4 = scmp.lt.s32.totalorder %s2529_s10, %s1966_s14 }
  0xe2   : > { %p1963_p3 = pnand %p1961_p8, %p1947_p1  ;;  %p1969_p12 = scmp.lt.s32.totalorder %s1967_s5, %s1960_s25 }
  0xe4   : > { %p1964_p9 = pneg %p1963_p3  ;;  %p1970_p6 = por %p1969_p12, %p1968_p4 }
  0xe6   : > { %p1971_p13 = pnand %p1970_p6, %p1964_p9 }
  0xe8   : > { %1974 = shalt.err (!%p1971_p13)
}
  0xe9   : > { %1687 = dma.hbm_to_vmem [thread:$0]  (!%p2525_p10), %s2520_s16, 128, %s2529_s10, %s500_s11  }
  0xea   : > { %s518_s3 = sand.u32 1, %s2199_s22   ;;  %s522_s4 = scalar_lea.vmem [#allocation5], %s2515_s30 }
  0xeb   : > { %s530_s6 = sshll.u32 %s522_s4, 4  ;;  %s519_s13 = scalar_lea.sflag [#allocation6], %s518_s3  ;;  %s531_s6 = int_to_ptr.vmem [resolvable:$true] %s530_s6 }
  0xec   : > { %s1975_s2 = scalar_lea.hbm %s2534_s26, 128  ;;  %s1980_s28 = scalar_lea.hbm %s2868_s1, 256 }
  0xed   : > { %p1976_p4 = scmp.ne.s32.totalorder %s2534_s26, %s1975_s2  ;;  %p1981_p0 = scmp.lt.u32.totalorder %s2534_s26, %s2868_s1 }
  0xee   : > { %p1982_p7 = scmp.lt.u32.totalorder %s1980_s28, %s1975_s2  ;;  %p1984_p8 = scmp.lt.u32.totalorder %s1975_s2, %s2534_s26 }
  0xef   : > { %p1978_p9 = pnand %p1976_p4, %p1947_p1 }
  0xf0   : > { %p1983_p5 = por %p1982_p7, %p1981_p0 }
  0xf1   : > { %p1979_p11 = pneg %p1978_p9 }
  0xf2   : > { %p1985_p3 = por %p1984_p8, %p1983_p5 }
  0xf4   : > { %p1986_p12 = pnand %p1985_p3, %p1979_p11 }
  0xf6   : > { %1989 = shalt.err (!%p1986_p12)
}
  0xf7   : > { %s1990_s11 = scalar_lea.vmem %s531_s6, 128  ;;  %s2210_s30 = smov [#allocation5]  }
  0xf8   : > { %p1991_p6 = scmp.ne.s32.totalorder %s531_s6, %s1990_s11  ;;  %s1995_s16 = sshll.u32 %s2210_s30, 4  ;;  %s1996_s16 = int_to_ptr.vmem [resolvable:$false] %s1995_s16 }
  0xf9   : > { %s1997_s10 = scalar_lea.vmem %s1996_s16, 256  ;;  %p1998_p9 = scmp.lt.s32.totalorder %s531_s6, %s1996_s16 }
  0xfa   : > { %p1993_p13 = pnand %p1991_p6, %p1947_p1  ;;  %p1999_p2 = scmp.lt.s32.totalorder %s1997_s10, %s1990_s11 }
  0xfc   : > { %p1994_p4 = pneg %p1993_p13  ;;  %p2000_p0 = por %p1999_p2, %p1998_p9 }
  0xfe   : > { %p2001_p7 = pnand %p2000_p0, %p1994_p4 }
 0x100   : > { %2004 = shalt.err (!%p2001_p7)
}
 0x101   : > { %1690 = dma.hbm_to_vmem [thread:$0]  (!%p2525_p10), %s2534_s26, 128, %s531_s6, %s519_s13  }
 0x102   : > { %p2869_p11 = scmp.ne.s32.totalorder %s2853_s24, 0 }
 0x103   : > { %s2585_s3 = sand.u32 (!%p2869_p11), 1, %s2183_s18   ;;  %p2870_p2 = scmp.ne.s32.totalorder (!%p2869_p11), %s2863_s15, 0 }
 0x104   : > { %539 = sbr.rel (%p2869_p11) target bundleno = 597 (0x255), region = 52  ;;  %s2588_s4 = sshll.u32 (!%p2869_p11), %s2585_s3, 3 }
 0x105   : > { %s542_s2 = scalar_lea.sflag (!%p2869_p11), [#allocation3], %s2585_s3  ;;  %s545_s29 = scalar_lea.vmem (!%p2869_p11), [#allocation2], %s2588_s4 }
 0x10b   : > { %2142 = dma.done.wait (%p2870_p2), %s542_s2, 128  }
 0x10c   : > { %2144 = vsyncadd (%p2870_p2), %s542_s2, 4294967168  ;;  %s2839_s24 = sand.u32 1, %s2309_s23   ;;  %s554_s26 = scalar_lea.vmem [#allocation5], %s2588_s4 }
 0x10d   : > { %s551_s12 = scalar_lea.sflag [#allocation6], %s2839_s24 }
 0x10e   : > { %2146 = dma.done.wait (%p2870_p2), %s551_s12, 128  }
 0x10f   : > { %2148 = vsyncadd (%p2870_p2), %s551_s12, 4294967168  ;;  %p2871_p10 = scmp.eq.s32.totalorder %s2309_s23, 0 }
 0x111   : > { %2150 = dma.done.wait (%p2871_p10), [#allocation6], 512   ;;  %p2872_p1 = pmov %p2871_p10 }
 0x113   : > { %2152 = vsyncadd (%p2872_p1), [#allocation6], 4294966784  ;;  %p2873_p5 = pmov %p2872_p1 }
 0x114   : > { %p2874_p8 = pmov %p2872_p1 }
 0x115   : > { %2154 = dma.done.wait (%p2873_p5), [#allocation9], 1024  }
 0x116   : > { %2156 = vsyncadd (%p2874_p8), [#allocation9], 4294966272  ;;  %p2875_p3 = pmov %p2872_p1 }
 0x117   : > { %p2876_p12 = pmov %p2872_p1 }
 0x118   : > { %2158 = dma.done.wait (%p2875_p3), [#allocation12], 1024  }
 0x119   : > { %2160 = vsyncadd (%p2876_p12), [#allocation12], 4294966272  ;;  %p2877_p6 = pmov %p2872_p1 }
 0x11a   : > { %p2878_p13 = pmov %p2872_p1 }
 0x11b   : > { %2162 = dma.done.wait (%p2877_p6), [#allocation15], 512  }
 0x11c   : > { %2164 = vsyncadd (%p2878_p13), [#allocation15], 4294966784  ;;  %v2211_v0 = vmov 0.0|0.0   ;;  %vm2212_vm0 = vmmov 0   ;;  %v2213_v1 = vmov 0.0   ;;  %v640_v2 = vld [vmem:[#allocation7] sm:$0xff] }
 0x11d   : > { %1589 = vmatprep.subr.bf16.mxu1 %v2211_v0  ;;  %1607 = vmatprep.subr.bf16.mxu0 %v2211_v0  ;;  %v641_v3 = vld [vmem:[#allocation7 + $0x8] sm:$0xff]  ;;  %v872_v4 = vld [vmem:[#allocation11] sm:$0xff]  ;;  %v642_v7 = vld [vmem:[#allocation7 + $0x10] sm:$0xff]  ;;  %vm644_vm1 = vcmask 261120   ;;  %s2879_s15 = sld [smem:[#allocation31_spill]]  ;;  %s615_s13 = scalar_lea.vmem [#allocation16], %s2588_s4 }
 0x11e   : > { %1531 = vmatprep.mubr.msk.f32.mxu1 %vm2212_vm0, %v2213_v1  ;;  %1564 = vmatprep.mubr.msk.f32.mxu0 %vm2212_vm0, %v2213_v1  ;;  %v1590_v5 = vpack.c.bf16 %v641_v3, %v640_v2  ;;  %v873_v6 = vld [vmem:[#allocation11 + $0x8] sm:$0xff]  ;;  %v643_v8 = vld [vmem:[#allocation7 + $0x18] sm:$0xff]  ;;  %v874_v10 = vld [vmem:[#allocation11 + $0x10] sm:$0xff]  ;;  %s1129_s25 = sshll.u32 %s615_s13, 4  ;;  %s2880_s5 = sld [smem:[#allocation39_spill]]  ;;  %s2664_s25 = int_to_ptr.vmem [resolvable:$true] %s1129_s25 }
 0x11f   : > { %v1608_v9 = vpack.c.bf16 %v873_v6, %v872_v4  ;;  %v875_v11 = vld [vmem:[#allocation11 + $0x18] sm:$0xff]  ;;  %v1593_v12 = vpack.c.bf16 %v643_v8, %v642_v7  ;;  %v722_v14 = vld [vmem:[#allocation10] sm:$0xff]  ;;  %v723_v15 = vld [vmem:[#allocation10 + $0x8] sm:$0xff]  ;;  %s629_s30 = scalar_lea.vmem [#allocation19], %s2588_s4  ;;  %s1099_s16 = scalar_lea.sflag [#allocation4], %s2585_s3 }
 0x120   : > { %1591 = vmatpush3.bf16.msra.mxu1 %v1590_v5  ;;  %v1611_v13 = vpack.c.bf16 %v875_v11, %v874_v10  ;;  %v950_v16 = vld [vmem:[#allocation14] sm:$0xff]  ;;  %v951_v17 = vld [vmem:[#allocation14 + $0x8] sm:$0xff]  ;;  %v1596_v19 = vpack.c.bf16 %v723_v15, %v722_v14  ;;  %v724_v21 = vld [vmem:[#allocation10 + $0x10] sm:$0xff]  ;;  %s2005_s10 = scalar_lea.vmem %s2664_s25, 128  ;;  %p2881_p9 = scmp.ne.s32.totalorder %s2864_s8, 0 }
 0x121   : > { %1609 = vmatpush3.bf16.msra.mxu0 %v1608_v9  ;;  %1592 = vmatprep.subr.bf16.mxu1 %v2211_v0  ;;  %v637_v18 = vld [vmem:[%s545_s29] sm:$0xff]  ;;  %v1614_v20 = vpack.c.bf16 %v951_v17, %v950_v16  ;;  %v725_v22 = vld [vmem:[#allocation10 + $0x18] sm:$0xff]  ;;  %v952_v23 = vld [vmem:[#allocation14 + $0x10] sm:$0xff]  ;;  %p2006_p4 = scmp.ne.s32.totalorder %s2664_s25, %s2005_s10  ;;  %s2214_s2 = smov [#allocation16]  }
 0x122   : > { %1610 = vmatprep.subr.bf16.mxu0 %v2211_v0  ;;  %v953_v24 = vld [vmem:[#allocation14 + $0x18] sm:$0xff]  ;;  %v1599_v25 = vpack.c.bf16 %v725_v22, %v724_v21  ;;  %v718_v27 = vld [vmem:[#allocation8] sm:$0xff]  ;;  %v719_v28 = vld [vmem:[#allocation8 + $0x8] sm:$0xff]  ;;  %v639_v31 = vmul.f32 %v637_v18, %v637_v18  ;;  %s2009_s29 = sshll.u32 %s2214_s2, 4  ;;  %s2010_s29 = int_to_ptr.vmem [resolvable:$false] %s2009_s29 }
 0x123   : > { %v1617_v26 = vpack.c.bf16 %v953_v24, %v952_v23  ;;  %v946_v29 = vld [vmem:[#allocation13] sm:$0xff]  ;;  %v947_v30 = vld [vmem:[#allocation13 + $0x8] sm:$0xff]  ;;  %v1602_v32 = vpack.c.bf16 %v719_v28, %v718_v27  ;;  %v720_v34 = vld [vmem:[#allocation8 + $0x10] sm:$0xff]  ;;  %s2655_s6 = sshll.u32 %s2879_s15, 7  ;;  %p2007_p0 = pnand %p2006_p4, %p2881_p9 }
 0x124   : > { %1594 = vmatpush3.bf16.msra.mxu1 %v1593_v12  ;;  %v1620_v33 = vpack.c.bf16 %v947_v30, %v946_v29  ;;  %v721_v35 = vld [vmem:[#allocation8 + $0x18] sm:$0xff]  ;;  %v948_v36 = vld [vmem:[#allocation13 + $0x10] sm:$0xff]  ;;  %s2662_s11 = scalar_lea.hbm %s2880_s5, %s2655_s6  ;;  %s2011_s12 = scalar_lea.vmem %s2010_s29, 256 }
 0x125   : > { %1612 = vmatpush3.bf16.msra.mxu0 %v1611_v13  ;;  %1595 = vmatprep.subr.bf16.mxu1 %v2211_v0  ;;  %v949_v37 = vld [vmem:[#allocation13 + $0x18] sm:$0xff]  ;;  %v1605_v38 = vpack.c.bf16 %v721_v35, %v720_v34  ;;  %p2008_p7 = pneg %p2007_p0  ;;  %p2012_p11 = scmp.lt.s32.totalorder %s2664_s25, %s2010_s29 }
 0x126   : > { %1613 = vmatprep.subr.bf16.mxu0 %v2211_v0  ;;  %v1623_v39 = vpack.c.bf16 %v949_v37, %v948_v36  ;;  %v638_v40 = vld [vmem:[%s554_s26] sm:$0xff]  ;;  %p2013_p2 = scmp.lt.s32.totalorder %s2011_s12, %s2005_s10 }
 0x127   : > { %1532 = vmatmul.mubr.msk.f32.vlgmr.msra.gmra.mrb[0].mxu1 %vm644_vm1, %v637_v18 }
 0x128   : > { %1597 = vmatpush3.bf16.msra.mxu1 %v1596_v19  ;;  %1565 = vmatmul.mubr.msk.f32.vlgmr.msra.gmra.mrb[0].mxu0 %vm644_vm1, %v637_v18  ;;  %p2014_p10 = por %p2013_p2, %p2012_p11 }
 0x129   : > { %1615 = vmatpush3.bf16.msra.mxu0 %v1614_v20  ;;  %1598 = vmatprep.subr.bf16.mxu1 %v2211_v0 }
 0x12a   : > { %1616 = vmatprep.subr.bf16.mxu0 %v2211_v0  ;;  %1542 = vmatprep.mubr.msk.f32.mxu1 %vm2212_vm0, %v2213_v1  ;;  %p2015_p1 = pnand %p2014_p10, %p2008_p7 }
 0x12b   : > { %1575 = vmatprep.mubr.msk.f32.mxu0 %vm2212_vm0, %v2213_v1 }
 0x12c   : > { %1600 = vmatpush3.bf16.msra.mxu1 %v1599_v25 }
 0x12d   : > { %1618 = vmatpush3.bf16.msra.mxu0 %v1617_v26  ;;  %1601 = vmatprep.subr.bf16.mxu1 %v2211_v0 }
 0x12e   : > { %1619 = vmatprep.subr.bf16.mxu0 %v2211_v0 }
 0x12f   : > { %1543 = vmatmul.mubr.msk.f32.vlgmr.msra.gmra.mrb[2].mxu1 %vm644_vm1, %v639_v31 }
 0x130   : > { %1576 = vmatmul.mubr.msk.f32.vlgmr.msra.gmra.mrb[2].mxu0 %vm644_vm1, %v639_v31  ;;  %1603 = vmatpush3.bf16.msra.mxu1 %v1602_v32 }
 0x131   : > { %1621 = vmatpush3.bf16.msra.mxu0 %v1620_v33  ;;  %1604 = vmatprep.subr.bf16.mxu1 %v2211_v0 }
 0x132   : > { %1622 = vmatprep.subr.bf16.mxu0 %v2211_v0  ;;  %1553 = vmatprep.mubr.msk.f32.mxu1 %vm2212_vm0, %v2213_v1 }
 0x133   : > { %1586 = vmatprep.mubr.msk.f32.mxu0 %vm2212_vm0, %v2213_v1 }
 0x134   : > { %1606 = vmatpush3.bf16.msra.mxu1 %v1605_v38 }
 0x135   : > { %1624 = vmatpush3.bf16.msra.mxu0 %v1623_v39 }
 0x137   : > { %1554 = vmatmul.mubr.msk.f32.vlgmr.msra.gmra.mrb[2].mxu1 %vm644_vm1, %v638_v40 }
 0x138   : > { %1587 = vmatmul.mubr.msk.f32.vlgmr.msra.gmra.mrb[2].mxu0 %vm644_vm1, %v638_v40 }
 0x1fa   : > { %v714_v41 = vpop.f32.mrb[0].mxu1 }
 0x1fb   : > { %1094 = vst.msk [vmem:[%s615_s13] sm:$0xff] %vm644_vm1, %v714_v41  ;;  %v1533_v42 = vpop.f32.mrb[1].mxu1  ;;  %v942_v43 = vpop.f32.mrb[0].mxu0 }
 0x1fc   : > { %1096 = vst.msk [vmem:[%s629_s30] sm:$0xff] %vm644_vm1, %v942_v43  ;;  %v1566_v44 = vpop.f32.mrb[1].mxu0 }
 0x1fd   : > { %2018 = shalt.err (!%p2015_p1)
}
 0x1fe   : > { %s2019_s26 = scalar_lea.hbm %s2662_s11, 128  ;;  %s2023_s28 = scalar_lea.hbm %s2880_s5, 256 }
 0x1ff   : > { %p2020_p5 = scmp.ne.s32.totalorder %s2662_s11, %s2019_s26  ;;  %p2024_p12 = scmp.lt.u32.totalorder %s2662_s11, %s2880_s5 }
 0x200   : > { %p2025_p6 = scmp.lt.u32.totalorder %s2023_s28, %s2019_s26  ;;  %p2027_p4 = scmp.lt.u32.totalorder %s2019_s26, %s2662_s11 }
 0x201   : > { %p2021_p8 = pnand %p2020_p5, %p2881_p9 }
 0x202   : > { %p2026_p13 = por %p2025_p6, %p2024_p12 }
 0x203   : > { %p2022_p3 = pneg %p2021_p8 }
 0x204   : > { %p2028_p0 = por %p2027_p4, %p2026_p13 }
 0x206   : > { %p2029_p7 = pnand %p2028_p0, %p2022_p3 }
 0x208   : > { %2032 = shalt.err (!%p2029_p7)
}
 0x209   : > { %1657 = dma.vmem_to_hbm [thread:$0]  (%p2881_p9), %s2664_s25, 128, %s2662_s11, %s1099_s16  }
 0x20a   : > { %s622_s10 = scalar_lea.vmem [#allocation17], %s2588_s4  ;;  %s1159_s12 = sshll.u32 %s629_s30, 4  ;;  %v868_v45 = vpop.f32.mrb[2].mxu1  ;;  %s2711_s12 = int_to_ptr.vmem [resolvable:$true] %s1159_s12 }
 0x20b   : > { %s1144_s29 = sshll.u32 %s622_s10, 4  ;;  %s2882_s13 = sld [smem:[#allocation40_spill]]  ;;  %1095 = vst.msk [vmem:[%s622_s10] sm:$0xff] %vm644_vm1, %v868_v45  ;;  %v1090_v46 = vpop.f32.mrb[2].mxu0  ;;  %v1555_v47 = vpop.f32.mrb[3].mxu1  ;;  %s2703_s29 = int_to_ptr.vmem [resolvable:$true] %s1144_s29 }
 0x20c   : > { %s636_s14 = scalar_lea.vmem [#allocation20], %s2588_s4  ;;  %s2883_s1 = sld [smem:[#allocation41_spill]]  ;;  %v1588_v48 = vpop.f32.mrb[3].mxu0 }
 0x20d   : > { %s1174_s2 = sshll.u32 %s636_s14, 4  ;;  %s2884_s30 = sld [smem:[#allocation42_spill]]  ;;  %1097 = vst.msk [vmem:[%s636_s14] sm:$0xff] %vm644_vm1, %v1090_v46  ;;  %s2720_s2 = int_to_ptr.vmem [resolvable:$true] %s1174_s2 }
 0x20e   : > { %s2885_s0 = sand.u32 1, %s2309_s23   ;;  %s2033_s26 = scalar_lea.vmem %s2703_s29, 128 }
 0x20f   : > { %s2725_s24 = scalar_lea.sflag [#allocation18], %s2885_s0  ;;  %p2034_p11 = scmp.ne.s32.totalorder %s2703_s29, %s2033_s26 }
 0x210   : > { %s2215_s10 = smov [#allocation17]  }
 0x211   : > { %s2700_s28 = scalar_lea.hbm %s2882_s13, %s2655_s6  ;;  %p2035_p2 = pnand %p2034_p11, %p2881_p9 }
 0x212   : > { %s2709_s25 = scalar_lea.hbm %s2883_s1, %s2655_s6  ;;  %s2037_s15 = sshll.u32 %s2215_s10, 4  ;;  %s2038_s15 = int_to_ptr.vmem [resolvable:$false] %s2037_s15 }
 0x213   : > { %s2718_s16 = scalar_lea.hbm %s2884_s30, %s2655_s6  ;;  %p2036_p10 = pneg %p2035_p2 }
 0x214   : > { %s2039_s5 = scalar_lea.vmem %s2038_s15, 256  ;;  %p2040_p1 = scmp.lt.s32.totalorder %s2703_s29, %s2038_s15 }
 0x215   : > { %p2041_p5 = scmp.lt.s32.totalorder %s2039_s5, %s2033_s26 }
 0x217   : > { %p2042_p8 = por %p2041_p5, %p2040_p1 }
 0x219   : > { %p2043_p3 = pnand %p2042_p8, %p2036_p10 }
 0x21b   : > { %2046 = shalt.err (!%p2043_p3)
}
 0x21c   : > { %s2047_s23 = scalar_lea.hbm %s2700_s28, 128  ;;  %s2051_s4 = scalar_lea.hbm %s2882_s13, 256 }
 0x21d   : > { %p2048_p12 = scmp.ne.s32.totalorder %s2700_s28, %s2047_s23  ;;  %p2052_p4 = scmp.lt.u32.totalorder %s2700_s28, %s2882_s13 }
 0x21e   : > { %p2053_p0 = scmp.lt.u32.totalorder %s2051_s4, %s2047_s23  ;;  %p2055_p11 = scmp.lt.u32.totalorder %s2047_s23, %s2700_s28 }
 0x21f   : > { %p2049_p6 = pnand %p2048_p12, %p2881_p9 }
 0x220   : > { %p2054_p7 = por %p2053_p0, %p2052_p4 }
 0x221   : > { %p2050_p13 = pneg %p2049_p6 }
 0x222   : > { %p2056_p2 = por %p2055_p11, %p2054_p7 }
 0x224   : > { %p2057_p10 = pnand %p2056_p2, %p2050_p13 }
 0x226   : > { %2060 = shalt.err (!%p2057_p10)
}
 0x227   : > { %1658 = dma.vmem_to_hbm [thread:$0]  (%p2881_p9), %s2703_s29, 128, %s2700_s28, %s2725_s24  }
 0x228   : > { %s2061_s5 = scalar_lea.vmem %s2711_s12, 128  ;;  %s2216_s26 = smov [#allocation19]  }
 0x229   : > { %p2062_p1 = scmp.ne.s32.totalorder %s2711_s12, %s2061_s5  ;;  %s2065_s10 = sshll.u32 %s2216_s26, 4  ;;  %s2066_s10 = int_to_ptr.vmem [resolvable:$false] %s2065_s10 }
 0x22a   : > { %s2067_s15 = scalar_lea.vmem %s2066_s10, 256  ;;  %p2068_p3 = scmp.lt.s32.totalorder %s2711_s12, %s2066_s10 }
 0x22b   : > { %p2063_p5 = pnand %p2062_p1, %p2881_p9  ;;  %p2069_p12 = scmp.lt.s32.totalorder %s2067_s15, %s2061_s5 }
 0x22d   : > { %p2064_p8 = pneg %p2063_p5  ;;  %p2070_p6 = por %p2069_p12, %p2068_p3 }
 0x22f   : > { %p2071_p13 = pnand %p2070_p6, %p2064_p8 }
 0x231   : > { %2074 = shalt.err (!%p2071_p13)
}
 0x232   : > { %s2075_s29 = scalar_lea.hbm %s2709_s25, 128  ;;  %s2079_s6 = scalar_lea.hbm %s2883_s1, 256 }
 0x233   : > { %p2076_p4 = scmp.ne.s32.totalorder %s2709_s25, %s2075_s29  ;;  %p2080_p11 = scmp.lt.u32.totalorder %s2709_s25, %s2883_s1 }
 0x234   : > { %p2081_p2 = scmp.lt.u32.totalorder %s2079_s6, %s2075_s29  ;;  %p2083_p1 = scmp.lt.u32.totalorder %s2075_s29, %s2709_s25 }
 0x235   : > { %p2077_p0 = pnand %p2076_p4, %p2881_p9 }
 0x236   : > { %p2082_p10 = por %p2081_p2, %p2080_p11 }
 0x237   : > { %p2078_p7 = pneg %p2077_p0 }
 0x238   : > { %p2084_p5 = por %p2083_p1, %p2082_p10 }
 0x23a   : > { %p2085_p8 = pnand %p2084_p5, %p2078_p7 }
 0x23c   : > { %2088 = shalt.err (!%p2085_p8)
}
 0x23d   : > { %1659 = dma.vmem_to_hbm [thread:$0]  (%p2881_p9), %s2711_s12, 128, %s2709_s25, %s2725_s24  }
 0x23e   : > { %s1114_s11 = scalar_lea.sflag [#allocation21], %s2585_s3  ;;  %s2089_s0 = scalar_lea.vmem %s2720_s2, 128 }
 0x23f   : > { %p2090_p3 = scmp.ne.s32.totalorder %s2720_s2, %s2089_s0  ;;  %s2217_s5 = smov [#allocation20]  }
 0x240   : > { %s2093_s26 = sshll.u32 %s2217_s5, 4  ;;  %s2094_s26 = int_to_ptr.vmem [resolvable:$false] %s2093_s26 }
 0x241   : > { %p2091_p12 = pnand %p2090_p3, %p2881_p9  ;;  %s2095_s10 = scalar_lea.vmem %s2094_s26, 256 }
 0x242   : > { %p2096_p13 = scmp.lt.s32.totalorder %s2720_s2, %s2094_s26  ;;  %p2097_p4 = scmp.lt.s32.totalorder %s2095_s10, %s2089_s0 }
 0x243   : > { %p2092_p6 = pneg %p2091_p12 }
 0x244   : > { %p2098_p0 = por %p2097_p4, %p2096_p13 }
 0x246   : > { %p2099_p7 = pnand %p2098_p0, %p2092_p6 }
 0x248   : > { %2102 = shalt.err (!%p2099_p7)
}
 0x249   : > { %s2103_s3 = scalar_lea.hbm %s2718_s16, 128  ;;  %s2107_s24 = scalar_lea.hbm %s2884_s30, 256 }
 0x24a   : > { %p2104_p11 = scmp.ne.s32.totalorder %s2718_s16, %s2103_s3  ;;  %p2108_p1 = scmp.lt.u32.totalorder %s2718_s16, %s2884_s30 }
 0x24b   : > { %p2109_p5 = scmp.lt.u32.totalorder %s2107_s24, %s2103_s3  ;;  %p2111_p3 = scmp.lt.u32.totalorder %s2103_s3, %s2718_s16 }
 0x24c   : > { %p2105_p2 = pnand %p2104_p11, %p2881_p9 }
 0x24d   : > { %p2110_p8 = por %p2109_p5, %p2108_p1 }
 0x24e   : > { %p2106_p10 = pneg %p2105_p2 }
 0x24f   : > { %p2112_p12 = por %p2111_p3, %p2110_p8 }
 0x251   : > { %p2113_p6 = pnand %p2112_p12, %p2106_p10 }
 0x253   : > { %2116 = shalt.err (!%p2113_p6)
}
 0x254   : > { %1660 = dma.vmem_to_hbm [thread:$0]  (%p2881_p9), %s2720_s2, 128, %s2718_s16, %s1114_s11  }
 0x255 PF: > { %s1186_s28 = sand.u32 1, %s2179_s17   ;;  %p2886_p13 = scmp.ne.s32.totalorder %s2865_s20, 0 }
 0x256   : > { %p2887_p4 = scmp.ge.s32.totalorder %s2199_s22, 2  ;;  %s1187_s23 = scalar_lea.sflag [#allocation4], %s1186_s28 }
 0x258   : > { %p1692_p0 = pnand %p2887_p4, %p2886_p13 }
 0x25a   : > { %2166 = dma.done.wait (!%p1692_p0), %s1187_s23, 128  }
 0x25b   : > { %2168 = vsyncadd (!%p1692_p0), %s1187_s23, 4294967168  ;;  %s2888_s6 = sadd.s32 4294967294, %s2199_s22  }
 0x25c   : > { %s1195_s14 = sand.u32 1, %s2888_s6  }
 0x25d   : > { %s1196_s4 = scalar_lea.sflag [#allocation18], %s1195_s14 }
 0x25e   : > { %2170 = dma.done.wait (!%p1692_p0), %s1196_s4, 256  }
 0x25f   : > { %2172 = vsyncadd (!%p1692_p0), %s1196_s4, 4294967040  ;;  %s1214_s8 = scalar_lea.sflag [#allocation21], %s1186_s28 }
 0x260   : > { %2174 = dma.done.wait (!%p1692_p0), %s1214_s8, 128  }
 0x261   : > { %2176 = vsyncadd (!%p1692_p0), %s1214_s8, 4294967168  ;;  %s40_s22 = sadd.s32 1, %s2199_s22   ;;  %s2889_s17 = smov %s2183_s18 }
 0x262   : > { %p37_p9 = scmp.ge.s32.totalorder %s40_s22, 4   ;;  %s2890_s18 = smov %s2187_s19 }
 0x263   : > { %s2891_s19 = smov %s2506_s9  ;;  %s2892_s20 = smov %s2195_s21 }
 0x264   : > { %s2893_s21 = smov %s2895_s27  ;;  %39 = sbr.rel (!%p37_p9) target bundleno = 27 (0x1b), region = 189 }
 0x26b   :  { %1219 = vsyncpa [#allocation3], 1 }
 0x26c   :  { %1221 = vsyncpa [#allocation3 + $0x1], 1 }
 0x26d   :  { %1222 = vsyncpa [#allocation6], 1 }
 0x26e   :  { %1224 = vsyncpa [#allocation6 + $0x1], 1 }
 0x26f   :  { %1225 = vsyncpa [#allocation9], 1 }
 0x270   :  { %1226 = vsyncpa [#allocation12], 1 }
 0x271   :  { %1227 = vsyncpa [#allocation15], 1 }
 0x272   :  { %1228 = vsyncpa [#allocation4], 1 }
 0x273   :  { %1230 = vsyncpa [#allocation4 + $0x1], 1 }
 0x274   :  { %1231 = vsyncpa [#allocation18], 1 }
 0x275   :  { %1233 = vsyncpa [#allocation18 + $0x1], 1 }
 0x276   :  { %1234 = vsyncpa [#allocation21], 1 }
 0x277   :  { %1236 = vsyncpa [#allocation21 + $0x1], 1 }

// kernel: tpu_custom_call.1
= control target key start
LH: loop header
LB: loop body
LE: loop exit
PB: predicated region body
PF: predicated region fallthrough
CT: control target
= control target key end

     0   :  { %s2818_s0 = inlined_call_operand.hbm [shape: f32[2,8,32], index: 0, kind: input, shape index: {}]   ;;  %s2819_s1 = inlined_call_operand.hbm [shape: f32[2,8,32], index: 1, kind: input, shape index: {}]   ;;  %s2820_s2 = inlined_call_operand.hbm [shape: f32[32,32], index: 2, kind: input, shape index: {}]   ;;  %s2821_s3 = inlined_call_operand.hbm [shape: f32[32,32], index: 3, kind: input, shape index: {}]   ;;  %s2822_s4 = inlined_call_operand.hbm [shape: f32[32,32], index: 4, kind: input, shape index: {}]   ;;  %s2823_s5 = inlined_call_operand.hbm [shape: f32[32,32], index: 5, kind: input, shape index: {}]   ;;  %s2824_s6 = inlined_call_operand.hbm [shape: f32[32,32], index: 6, kind: input, shape index: {}]   ;;  %s2825_s7 = inlined_call_operand.hbm [shape: f32[32,32], index: 7, kind: input, shape index: {}]   ;;  %s2826_s8 = inlined_call_operand.hbm [shape: f32[2,8,32], index: 8, kind: output, shape index: {0}]   ;;  %s2827_s9 = inlined_call_operand.hbm [shape: f32[2,8,32], index: 9, kind: output, shape index: {1}]   ;;  %s2828_s10 = inlined_call_operand.hbm [shape: f32[2,8,32], index: 10, kind: output, shape index: {2}]   ;;  %s2829_s11 = inlined_call_operand.hbm [shape: f32[2,8,32], index: 11, kind: output, shape index: {3}]  }
   0x1   :  { %2841 = sst [smem:[#allocation32_spill]] %s2818_s0 }
   0x2   :  { %2842 = sst [smem:[#allocation33_spill]] %s2819_s1 }
   0x3   :  { %2843 = sst [smem:[#allocation34_spill]] %s2820_s2 }
   0x4   :  { %2844 = sst [smem:[#allocation35_spill]] %s2821_s3 }
   0x5   :  { %2845 = sst [smem:[#allocation36_spill]] %s2822_s4 }
   0x6   :  { %2846 = sst [smem:[#allocation37_spill]] %s2823_s5 }
   0x7   :  { %2847 = sst [smem:[#allocation38_spill]] %s2824_s6 }
   0x8   :  { %2848 = sst [smem:[#allocation39_spill]] %s2826_s8 }
   0x9   :  { %2849 = sst [smem:[#allocation40_spill]] %s2827_s9 }
   0xa   :  { %2850 = sst [smem:[#allocation41_spill]] %s2828_s10 }
   0xb   :  { %2851 = sst [smem:[#allocation42_spill]] %s2829_s11 }
   0xc   :  { %17 = vsyncpa [#allocation3], 0 }
   0xd   :  { %19 = vsyncpa [#allocation3 + $0x1], 0 }
   0xe   :  { %20 = vsyncpa [#allocation6], 0 }
   0xf   :  { %22 = vsyncpa [#allocation6 + $0x1], 0 }
  0x10   :  { %23 = vsyncpa [#allocation9], 0 }
  0x11   :  { %24 = vsyncpa [#allocation12], 0 }
  0x12   :  { %25 = vsyncpa [#allocation15], 0 }
  0x13   :  { %26 = vsyncpa [#allocation4], 0 }
  0x14   :  { %28 = vsyncpa [#allocation4 + $0x1], 0 }
  0x15   :  { %29 = vsyncpa [#allocation18], 0 }
  0x16   :  { %31 = vsyncpa [#allocation18 + $0x1], 0 }
  0x17   :  { %32 = vsyncpa [#allocation21], 0 }
  0x18   :  { %34 = vsyncpa [#allocation21 + $0x1], 0  ;;  %s2278_s17 = smov 0   ;;  %s2280_s18 = smov 0  }
  0x19   :  { %s2282_s19 = smov 0   ;;  %s2284_s20 = smov 0  }
  0x1a   :  { %s2286_s21 = smov 0   ;;  %s2288_s22 = smov 0  }
  0x1b LB: > { %2852 = sst [smem:[#allocation31_spill]] %s2191_s20  ;;  %s2309_s23 = sadd.s32 4294967295, %s2199_s22   ;;  %s2199_s22 = sphi %s2288_s22, %s40_s22   ;;  %s2195_s21 = sphi %s2286_s21, %s2893_s21   ;;  %s2191_s20 = sphi %s2284_s20, %s2892_s20   ;;  %s2187_s19 = sphi %s2282_s19, %s2891_s19   ;;  %s2183_s18 = sphi %s2280_s18, %s2890_s18   ;;  %s2179_s17 = sphi %s2278_s17, %s2889_s17  }
  0x1c   : > { %p1452_p0 = scmp.ge.s32.totalorder %s2199_s22, 1  ;;  %p2834_p1 = scmp.eq.s32.totalorder %s2309_s23, 0 }
  0x1d   : > { %p396_p2 = scmp.lt.s32.totalorder %s2199_s22, 3  ;;  %s2201_s25 = smov [#allocation7]  }
  0x1e   : > { %s410_s26 = sshll.u32 %s2201_s25, 4  ;;  %s2202_s28 = smov [#allocation8]   ;;  %s2318_s26 = int_to_ptr.vmem [resolvable:$true] %s410_s26 }
  0x1f   : > { %p2314_p3 = pnand %p1452_p0, %p396_p2  ;;  %s425_s29 = sshll.u32 %s2202_s28, 4  ;;  %s2329_s29 = int_to_ptr.vmem [resolvable:$true] %s425_s29 }
  0x20   : > { %s2203_s30 = smov [#allocation11]   ;;  %s2855_s2 = sld [smem:[#allocation34_spill]] }
  0x21   : > { %s2853_s24 = scalar_select %p2314_p3, 1, 0 }
  0x22   : > { %p1665_p4 = pneg %p2314_p3  ;;  %s2331_s12 = sshll.u32 %s2203_s30, 4  ;;  %s456_s12 = int_to_ptr.vmem [resolvable:$true] %s2331_s12 }
  0x24   : > { %p2325_p6 = pnand %p1665_p4, %p2834_p1 }
  0x26   : > { %s1777_s15 = scalar_lea.hbm %s2855_s2, 512  ;;  %p2341_p8 = pneg %p2325_p6 }
  0x27   : > { %p1778_p7 = scmp.ne.s32.totalorder %s2855_s2, %s1777_s15  ;;  %p1784_p11 = scmp.lt.u32.totalorder %s1777_s15, %s2855_s2 }
  0x29   : > { %p1780_p9 = pnand %p2341_p8, %p1778_p7 }
  0x2b   : > { %p1781_p10 = pneg %p1780_p9 }
  0x2d   : > { %p1786_p12 = pnand %p1784_p11, %p1781_p10 }
  0x2f   : > { %1789 = shalt.err (!%p1786_p12)
}
  0x30   : > { %s1790_s13 = scalar_lea.vmem %s2318_s26, 512  ;;  %p1798_p4 = scmp.lt.s32.totalorder %s2318_s26, %s2318_s26 }
  0x31   : > { %p1791_p13 = scmp.ne.s32.totalorder %s2318_s26, %s1790_s13  ;;  %p1799_p5 = scmp.lt.s32.totalorder %s1790_s13, %s1790_s13 }
  0x33   : > { %p1793_p0 = pnand %p1791_p13, %p2341_p8  ;;  %p1800_p7 = por %p1799_p5, %p1798_p4 }
  0x35   : > { %p1794_p2 = pneg %p1793_p0 }
  0x37   : > { %p1801_p9 = pnand %p1800_p7, %p1794_p2 }
  0x39   : > { %1804 = shalt.err (!%p1801_p9)
}
  0x3a   : > { %s2204_s14 = smov 128   ;;  %s2205_s15 = smov 8  }
  0x3b   : > { %1668 = dma.hbm_to_vmem [thread:$0]  (!%p2325_p6), %s2855_s2, 512, %s2318_s26, [#allocation6], %s2204_s14, %s2204_s14, %s2205_s15  }
  0x3c   : > { %s2857_s3 = sld [smem:[#allocation35_spill]] }
  0x42   : > { %s1805_s13 = scalar_lea.hbm %s2857_s3, 512 }
  0x43   : > { %p1806_p5 = scmp.ne.s32.totalorder %s2857_s3, %s1805_s13  ;;  %p1812_p12 = scmp.lt.u32.totalorder %s1805_s13, %s2857_s3 }
  0x45   : > { %p1808_p10 = pnand %p1806_p5, %p2341_p8 }
  0x47   : > { %p1809_p11 = pneg %p1808_p10 }
  0x49   : > { %p1814_p13 = pnand %p1812_p12, %p1809_p11 }
  0x4b   : > { %1817 = shalt.err (!%p1814_p13)
}
  0x4c   : > { %s1818_s26 = scalar_lea.vmem %s2329_s29, 512  ;;  %p1826_p7 = scmp.lt.s32.totalorder %s2329_s29, %s2329_s29 }
  0x4d   : > { %p1819_p0 = scmp.ne.s32.totalorder %s2329_s29, %s1818_s26  ;;  %p1827_p9 = scmp.lt.s32.totalorder %s1818_s26, %s1818_s26 }
  0x4f   : > { %p1821_p2 = pnand %p1819_p0, %p2341_p8  ;;  %p1828_p5 = por %p1827_p9, %p1826_p7 }
  0x51   : > { %p1822_p4 = pneg %p1821_p2 }
  0x53   : > { %p1829_p10 = pnand %p1828_p5, %p1822_p4 }
  0x55   : > { %1832 = shalt.err (!%p1829_p10)
}
  0x56   : > { %1671 = dma.hbm_to_vmem [thread:$0]  (!%p2325_p6), %s2857_s3, 512, %s2329_s29, [#allocation9], %s2204_s14, %s2204_s14, %s2205_s15  }
  0x57   : > { %s2858_s5 = sld [smem:[#allocation37_spill]] }
  0x5d   : > { %s1833_s16 = scalar_lea.hbm %s2858_s5, 512 }
  0x5e   : > { %p1834_p11 = scmp.ne.s32.totalorder %s2858_s5, %s1833_s16  ;;  %p1840_p0 = scmp.lt.u32.totalorder %s1833_s16, %s2858_s5 }
  0x60   : > { %p1836_p12 = pnand %p1834_p11, %p2341_p8 }
  0x62   : > { %p1837_p13 = pneg %p1836_p12 }
  0x64   : > { %p1842_p2 = pnand %p1840_p0, %p1837_p13 }
  0x66   : > { %1845 = shalt.err (!%p1842_p2)
}
  0x67   : > { %s1846_s26 = scalar_lea.vmem %s456_s12, 512  ;;  %p1854_p5 = scmp.lt.s32.totalorder %s456_s12, %s456_s12 }
  0x68   : > { %p1847_p4 = scmp.ne.s32.totalorder %s456_s12, %s1846_s26  ;;  %p1855_p10 = scmp.lt.s32.totalorder %s1846_s26, %s1846_s26 }
  0x6a   : > { %p1849_p7 = pnand %p1847_p4, %p2341_p8  ;;  %p1856_p1 = por %p1855_p10, %p1854_p5 }
  0x6c   : > { %p1850_p9 = pneg %p1849_p7 }
  0x6e   : > { %p1857_p3 = pnand %p1856_p1, %p1850_p9 }
  0x70   : > { %1860 = shalt.err (!%p1857_p3)
}
  0x71   : > { %1677 = dma.hbm_to_vmem [thread:$0]  (!%p2325_p6), %s2858_s5, 512, %s456_s12, [#allocation12], %s2204_s14, %s2204_s14, %s2205_s15  }
  0x72   : > { %s2206_s9 = smov [#allocation10]   ;;  %s2207_s20 = smov [#allocation13]  }
  0x73   : > { %s440_s10 = sshll.u32 %s2206_s9, 4  ;;  %s470_s16 = sshll.u32 %s2207_s20, 4  ;;  %s441_s10 = int_to_ptr.vmem [resolvable:$true] %s440_s10  ;;  %s471_s16 = int_to_ptr.vmem [resolvable:$true] %s470_s16 }
  0x74   : > { %s2859_s4 = sld [smem:[#allocation36_spill]] }
  0x7a   : > { %s1861_s30 = scalar_lea.hbm %s2859_s4, 512 }
  0x7b   : > { %p1862_p1 = scmp.ne.s32.totalorder %s2859_s4, %s1861_s30  ;;  %p1868_p12 = scmp.lt.u32.totalorder %s1861_s30, %s2859_s4 }
  0x7d   : > { %p1864_p3 = pnand %p1862_p1, %p2341_p8 }
  0x7f   : > { %p1865_p11 = pneg %p1864_p3 }
  0x81   : > { %p1870_p13 = pnand %p1868_p12, %p1865_p11 }
  0x83   : > { %1873 = shalt.err (!%p1870_p13)
}
  0x84   : > { %s1874_s12 = scalar_lea.vmem %s441_s10, 512  ;;  %p1882_p7 = scmp.lt.s32.totalorder %s441_s10, %s441_s10 }
  0x85   : > { %p1875_p0 = scmp.ne.s32.totalorder %s441_s10, %s1874_s12  ;;  %p1883_p9 = scmp.lt.s32.totalorder %s1874_s12, %s1874_s12 }
  0x87   : > { %p1877_p2 = pnand %p1875_p0, %p2341_p8  ;;  %p1884_p5 = por %p1883_p9, %p1882_p7 }
  0x89   : > { %p1878_p4 = pneg %p1877_p2 }
  0x8b   : > { %p1885_p10 = pnand %p1884_p5, %p1878_p4 }
  0x8d   : > { %1888 = shalt.err (!%p1885_p10)
}
  0x8e   : > { %1674 = dma.hbm_to_vmem [thread:$0]  (!%p2325_p6), %s2859_s4, 512, %s441_s10, [#allocation9], %s2204_s14, %s2204_s14, %s2205_s15  }
  0x8f   : > { %s2860_s6 = sld [smem:[#allocation38_spill]] }
  0x95   : > { %s1889_s25 = scalar_lea.hbm %s2860_s6, 512 }
  0x96   : > { %p1890_p1 = scmp.ne.s32.totalorder %s2860_s6, %s1889_s25  ;;  %p1896_p12 = scmp.lt.u32.totalorder %s1889_s25, %s2860_s6 }
  0x98   : > { %p1892_p3 = pnand %p1890_p1, %p2341_p8 }
  0x9a   : > { %p1893_p11 = pneg %p1892_p3 }
  0x9c   : > { %p1898_p13 = pnand %p1896_p12, %p1893_p11 }
  0x9e   : > { %1901 = shalt.err (!%p1898_p13)
}
  0x9f   : > { %s1902_s29 = scalar_lea.vmem %s471_s16, 512  ;;  %p1910_p7 = scmp.lt.s32.totalorder %s471_s16, %s471_s16 }
  0xa0   : > { %p1903_p0 = scmp.ne.s32.totalorder %s471_s16, %s1902_s29  ;;  %p1911_p9 = scmp.lt.s32.totalorder %s1902_s29, %s1902_s29 }
  0xa2   : > { %p1905_p2 = pnand %p1903_p0, %p2341_p8  ;;  %p1912_p5 = por %p1911_p9, %p1910_p7 }
  0xa4   : > { %p1906_p4 = pneg %p1905_p2 }
  0xa6   : > { %p1913_p10 = pnand %p1912_p5, %p1906_p4 }
  0xa8   : > { %1916 = shalt.err (!%p1913_p10)
}
  0xa9   : > { %1680 = dma.hbm_to_vmem [thread:$0]  (!%p2325_p6), %s2860_s6, 512, %s471_s16, [#allocation12], %s2204_s14, %s2204_s14, %s2205_s15  }
  0xaa   : > { %s2208_s2 = smov [#allocation14]   ;;  %s1917_s25 = scalar_lea.hbm %s2825_s7, 512 }
  0xab   : > { %s485_s8 = sshll.u32 %s2208_s2, 4  ;;  %p1918_p1 = scmp.ne.s32.totalorder %s2825_s7, %s1917_s25  ;;  %s486_s8 = int_to_ptr.vmem [resolvable:$true] %s485_s8 }
  0xac   : > { %p1924_p12 = scmp.lt.u32.totalorder %s1917_s25, %s2825_s7 }
  0xad   : > { %p1920_p3 = pnand %p1918_p1, %p2341_p8 }
  0xaf   : > { %p1921_p11 = pneg %p1920_p3 }
  0xb1   : > { %p1926_p13 = pnand %p1924_p12, %p1921_p11 }
  0xb3   : > { %1929 = shalt.err (!%p1926_p13)
}
  0xb4   : > { %s1930_s16 = scalar_lea.vmem %s486_s8, 512  ;;  %p1938_p7 = scmp.lt.s32.totalorder %s486_s8, %s486_s8 }
  0xb5   : > { %p1931_p0 = scmp.ne.s32.totalorder %s486_s8, %s1930_s16  ;;  %p1939_p9 = scmp.lt.s32.totalorder %s1930_s16, %s1930_s16 }
  0xb7   : > { %p1933_p2 = pnand %p1931_p0, %p2341_p8  ;;  %p1940_p5 = por %p1939_p9, %p1938_p7 }
  0xb9   : > { %p1934_p4 = pneg %p1933_p2 }
  0xbb   : > { %p1941_p10 = pnand %p1940_p5, %p1934_p4 }
  0xbd   : > { %1944 = shalt.err (!%p1941_p10)
}
  0xbe   : > { %1683 = dma.hbm_to_vmem [thread:$0]  (!%p2325_p6), %s2825_s7, 512, %s486_s8, [#allocation15], %s2204_s14, %s2204_s14, %s2205_s15  }
  0xbf   : > { %s2836_s11 = sadd.s32 4294967294, %s2199_s22   ;;  %s55_s27 = sadd.s32 1, %s2195_s21 }
  0xc0   : > { %p57_p8 = scmp.ge.s32.totalorder %s55_s27, 2  ;;  %s68_s12 = sadd.s32 1, %s2187_s19 }
  0xc1   : > { %p75_p1 = scmp.ne.s32.totalorder %s2187_s19, %s2183_s18  ;;  %p76_p3 = scmp.eq.s32.totalorder %s2199_s22, 0 }
  0xc2   : > { %s2895_s27 = smov (%p57_p8, %s55_s27), 0  ;;  %p81_p12 = scmp.ne.s32.totalorder %s2183_s18, %s2179_s17 }
  0xc3   : > { %p2484_p11 = por %p76_p3, %p75_p1  ;;  %s63_s14 = ssub.s32 %s2195_s21, %s2895_s27 }
  0xc4   : > { %p293_p6 = scmp.eq.s32.totalorder %s2309_s23, 1  ;;  %p66_p13 = scmp.eq.s32.totalorder %s63_s14, 0 }
  0xc5   : > { %p2862_p0 = scmp.eq.s32.totalorder %s2309_s23, 0  ;;  %p299_p7 = scmp.eq.s32.totalorder %s2836_s11, 1 }
  0xc6   : > { %p2499_p4 = por %p293_p6, %p75_p1  ;;  %p1710_p5 = scmp.lt.s32.totalorder %s2199_s22, 2 }
  0xc7   : > { %p2495_p2 = por %p2862_p0, %p81_p12  ;;  %p2508_p9 = por %p299_p7, %p81_p12 }
  0xc8   : > { %s2864_s8 = scalar_select %p2499_p4, 1, 0 }
  0xc9   : > { %s2863_s15 = scalar_select %p2495_p2, 1, 0 }
  0xca   : > { %s2506_s9 = scalar_select %p66_p13, %s2187_s19, %s68_s12  }
  0xcb   : > { %s2865_s20 = scalar_select %p2508_p9, 1, 0 }
  0xcc   : > { %s499_s25 = sand.u32 1, %s2187_s19   ;;  %s1461_s28 = sshll.u32 %s2195_s21, 7 }
  0xcd   : > { %s2515_s30 = sshll.u32 %s499_s25, 3  ;;  %s2866_s0 = sld [smem:[#allocation32_spill]] }
  0xce   : > { %s503_s29 = scalar_lea.vmem [#allocation2], %s2515_s30  ;;  %p2525_p10 = pnand %p1710_p5, %p2484_p11 }
  0xcf   : > { %s511_s10 = sshll.u32 %s503_s29, 4  ;;  %s2868_s1 = sld [smem:[#allocation33_spill]]  ;;  %s2529_s10 = int_to_ptr.vmem [resolvable:$true] %s511_s10 }
  0xd0   : > { %s500_s11 = scalar_lea.sflag [#allocation3], %s499_s25  ;;  %p1947_p1 = pneg %p2525_p10 }
  0xd3   : > { %s2520_s16 = scalar_lea.hbm %s2866_s0, %s1461_s28  ;;  %s1950_s4 = scalar_lea.hbm %s2866_s0, 256 }
  0xd4   : > { %s1945_s3 = scalar_lea.hbm %s2520_s16, 128  ;;  %p1951_p12 = scmp.lt.u32.totalorder %s2520_s16, %s2866_s0 }
  0xd5   : > { %s2534_s26 = scalar_lea.hbm %s2868_s1, %s1461_s28  ;;  %p1946_p8 = scmp.ne.s32.totalorder %s2520_s16, %s1945_s3 }
  0xd6   : > { %p1952_p6 = scmp.lt.u32.totalorder %s1950_s4, %s1945_s3  ;;  %p1954_p0 = scmp.lt.u32.totalorder %s1945_s3, %s2520_s16 }
  0xd7   : > { %p1948_p3 = pnand %p1947_p1, %p1946_p8 }
  0xd8   : > { %p1953_p13 = por %p1952_p6, %p1951_p12 }
  0xd9   : > { %p1949_p11 = pneg %p1948_p3 }
  0xda   : > { %p1955_p7 = por %p1954_p0, %p1953_p13 }
  0xdc   : > { %p1956_p5 = pnand %p1955_p7, %p1949_p11 }
  0xde   : > { %1959 = shalt.err (!%p1956_p5)
}
  0xdf   : > { %s1960_s25 = scalar_lea.vmem %s2529_s10, 128  ;;  %s2209_s28 = smov [#allocation2]  }
  0xe0   : > { %p1961_p8 = scmp.ne.s32.totalorder %s2529_s10, %s1960_s25  ;;  %s1965_s14 = sshll.u32 %s2209_s28, 4  ;;  %s1966_s14 = int_to_ptr.vmem [resolvable:$false] %s1965_s14 }
  0xe1   : > { %s1967_s5 = scalar_lea.vmem %s1966_s14, 256  ;;  %p1968_p4 = scmp.lt.s32.totalorder %s2529_s10, %s1966_s14 }
  0xe2   : > { %p1963_p3 = pnand %p1961_p8, %p1947_p1  ;;  %p1969_p12 = scmp.lt.s32.totalorder %s1967_s5, %s1960_s25 }
  0xe4   : > { %p1964_p9 = pneg %p1963_p3  ;;  %p1970_p6 = por %p1969_p12, %p1968_p4 }
  0xe6   : > { %p1971_p13 = pnand %p1970_p6, %p1964_p9 }
  0xe8   : > { %1974 = shalt.err (!%p1971_p13)
}
  0xe9   : > { %1687 = dma.hbm_to_vmem [thread:$0]  (!%p2525_p10), %s2520_s16, 128, %s2529_s10, %s500_s11  }
  0xea   : > { %s518_s3 = sand.u32 1, %s2199_s22   ;;  %s522_s4 = scalar_lea.vmem [#allocation5], %s2515_s30 }
  0xeb   : > { %s530_s6 = sshll.u32 %s522_s4, 4  ;;  %s519_s13 = scalar_lea.sflag [#allocation6], %s518_s3  ;;  %s531_s6 = int_to_ptr.vmem [resolvable:$true] %s530_s6 }
  0xec   : > { %s1975_s2 = scalar_lea.hbm %s2534_s26, 128  ;;  %s1980_s28 = scalar_lea.hbm %s2868_s1, 256 }
  0xed   : > { %p1976_p4 = scmp.ne.s32.totalorder %s2534_s26, %s1975_s2  ;;  %p1981_p0 = scmp.lt.u32.totalorder %s2534_s26, %s2868_s1 }
  0xee   : > { %p1982_p7 = scmp.lt.u32.totalorder %s1980_s28, %s1975_s2  ;;  %p1984_p8 = scmp.lt.u32.totalorder %s1975_s2, %s2534_s26 }
  0xef   : > { %p1978_p9 = pnand %p1976_p4, %p1947_p1 }
  0xf0   : > { %p1983_p5 = por %p1982_p7, %p1981_p0 }
  0xf1   : > { %p1979_p11 = pneg %p1978_p9 }
  0xf2   : > { %p1985_p3 = por %p1984_p8, %p1983_p5 }
  0xf4   : > { %p1986_p12 = pnand %p1985_p3, %p1979_p11 }
  0xf6   : > { %1989 = shalt.err (!%p1986_p12)
}
  0xf7   : > { %s1990_s11 = scalar_lea.vmem %s531_s6, 128  ;;  %s2210_s30 = smov [#allocation5]  }
  0xf8   : > { %p1991_p6 = scmp.ne.s32.totalorder %s531_s6, %s1990_s11  ;;  %s1995_s16 = sshll.u32 %s2210_s30, 4  ;;  %s1996_s16 = int_to_ptr.vmem [resolvable:$false] %s1995_s16 }
  0xf9   : > { %s1997_s10 = scalar_lea.vmem %s1996_s16, 256  ;;  %p1998_p9 = scmp.lt.s32.totalorder %s531_s6, %s1996_s16 }
  0xfa   : > { %p1993_p13 = pnand %p1991_p6, %p1947_p1  ;;  %p1999_p2 = scmp.lt.s32.totalorder %s1997_s10, %s1990_s11 }
  0xfc   : > { %p1994_p4 = pneg %p1993_p13  ;;  %p2000_p0 = por %p1999_p2, %p1998_p9 }
  0xfe   : > { %p2001_p7 = pnand %p2000_p0, %p1994_p4 }
 0x100   : > { %2004 = shalt.err (!%p2001_p7)
}
 0x101   : > { %1690 = dma.hbm_to_vmem [thread:$0]  (!%p2525_p10), %s2534_s26, 128, %s531_s6, %s519_s13  }
 0x102   : > { %p2869_p11 = scmp.ne.s32.totalorder %s2853_s24, 0 }
 0x103   : > { %s2585_s3 = sand.u32 (!%p2869_p11), 1, %s2183_s18   ;;  %p2870_p2 = scmp.ne.s32.totalorder (!%p2869_p11), %s2863_s15, 0 }
 0x104   : > { %539 = sbr.rel (%p2869_p11) target bundleno = 597 (0x255), region = 52  ;;  %s2588_s4 = sshll.u32 (!%p2869_p11), %s2585_s3, 3 }
 0x105   : > { %s542_s2 = scalar_lea.sflag (!%p2869_p11), [#allocation3], %s2585_s3  ;;  %s545_s29 = scalar_lea.vmem (!%p2869_p11), [#allocation2], %s2588_s4 }
 0x10b   : > { %2142 = dma.done.wait (%p2870_p2), %s542_s2, 128  }
 0x10c   : > { %2144 = vsyncadd (%p2870_p2), %s542_s2, 4294967168  ;;  %s2839_s24 = sand.u32 1, %s2309_s23   ;;  %s554_s26 = scalar_lea.vmem [#allocation5], %s2588_s4 }
 0x10d   : > { %s551_s12 = scalar_lea.sflag [#allocation6], %s2839_s24 }
 0x10e   : > { %2146 = dma.done.wait (%p2870_p2), %s551_s12, 128  }
 0x10f   : > { %2148 = vsyncadd (%p2870_p2), %s551_s12, 4294967168  ;;  %p2871_p10 = scmp.eq.s32.totalorder %s2309_s23, 0 }
 0x111   : > { %2150 = dma.done.wait (%p2871_p10), [#allocation6], 512   ;;  %p2872_p1 = pmov %p2871_p10 }
 0x113   : > { %2152 = vsyncadd (%p2872_p1), [#allocation6], 4294966784  ;;  %p2873_p5 = pmov %p2872_p1 }
 0x114   : > { %p2874_p8 = pmov %p2872_p1 }
 0x115   : > { %2154 = dma.done.wait (%p2873_p5), [#allocation9], 1024  }
 0x116   : > { %2156 = vsyncadd (%p2874_p8), [#allocation9], 4294966272  ;;  %p2875_p3 = pmov %p2872_p1 }
 0x117   : > { %p2876_p12 = pmov %p2872_p1 }
 0x118   : > { %2158 = dma.done.wait (%p2875_p3), [#allocation12], 1024  }
 0x119   : > { %2160 = vsyncadd (%p2876_p12), [#allocation12], 4294966272  ;;  %p2877_p6 = pmov %p2872_p1 }
 0x11a   : > { %p2878_p13 = pmov %p2872_p1 }
 0x11b   : > { %2162 = dma.done.wait (%p2877_p6), [#allocation15], 512  }
 0x11c   : > { %2164 = vsyncadd (%p2878_p13), [#allocation15], 4294966784  ;;  %v2211_v0 = vmov 0.0|0.0   ;;  %vm2212_vm0 = vmmov 0   ;;  %v2213_v1 = vmov 0.0   ;;  %v640_v2 = vld [vmem:[#allocation7] sm:$0xff] }
 0x11d   : > { %1589 = vmatprep.subr.bf16.mxu1 %v2211_v0  ;;  %1607 = vmatprep.subr.bf16.mxu0 %v2211_v0  ;;  %v641_v3 = vld [vmem:[#allocation7 + $0x8] sm:$0xff]  ;;  %v872_v4 = vld [vmem:[#allocation11] sm:$0xff]  ;;  %v642_v7 = vld [vmem:[#allocation7 + $0x10] sm:$0xff]  ;;  %vm644_vm1 = vcmask 261120   ;;  %s2879_s15 = sld [smem:[#allocation31_spill]]  ;;  %s615_s13 = scalar_lea.vmem [#allocation16], %s2588_s4 }
 0x11e   : > { %1531 = vmatprep.mubr.msk.f32.mxu1 %vm2212_vm0, %v2213_v1  ;;  %1564 = vmatprep.mubr.msk.f32.mxu0 %vm2212_vm0, %v2213_v1  ;;  %v1590_v5 = vpack.c.bf16 %v641_v3, %v640_v2  ;;  %v873_v6 = vld [vmem:[#allocation11 + $0x8] sm:$0xff]  ;;  %v643_v8 = vld [vmem:[#allocation7 + $0x18] sm:$0xff]  ;;  %v874_v10 = vld [vmem:[#allocation11 + $0x10] sm:$0xff]  ;;  %s1129_s25 = sshll.u32 %s615_s13, 4  ;;  %s2880_s5 = sld [smem:[#allocation39_spill]]  ;;  %s2664_s25 = int_to_ptr.vmem [resolvable:$true] %s1129_s25 }
 0x11f   : > { %v1608_v9 = vpack.c.bf16 %v873_v6, %v872_v4  ;;  %v875_v11 = vld [vmem:[#allocation11 + $0x18] sm:$0xff]  ;;  %v1593_v12 = vpack.c.bf16 %v643_v8, %v642_v7  ;;  %v722_v14 = vld [vmem:[#allocation10] sm:$0xff]  ;;  %v723_v15 = vld [vmem:[#allocation10 + $0x8] sm:$0xff]  ;;  %s629_s30 = scalar_lea.vmem [#allocation19], %s2588_s4  ;;  %s1099_s16 = scalar_lea.sflag [#allocation4], %s2585_s3 }
 0x120   : > { %1591 = vmatpush3.bf16.msra.mxu1 %v1590_v5  ;;  %v1611_v13 = vpack.c.bf16 %v875_v11, %v874_v10  ;;  %v950_v16 = vld [vmem:[#allocation14] sm:$0xff]  ;;  %v951_v17 = vld [vmem:[#allocation14 + $0x8] sm:$0xff]  ;;  %v1596_v19 = vpack.c.bf16 %v723_v15, %v722_v14  ;;  %v724_v21 = vld [vmem:[#allocation10 + $0x10] sm:$0xff]  ;;  %s2005_s10 = scalar_lea.vmem %s2664_s25, 128  ;;  %p2881_p9 = scmp.ne.s32.totalorder %s2864_s8, 0 }
 0x121   : > { %1609 = vmatpush3.bf16.msra.mxu0 %v1608_v9  ;;  %1592 = vmatprep.subr.bf16.mxu1 %v2211_v0  ;;  %v637_v18 = vld [vmem:[%s545_s29] sm:$0xff]  ;;  %v1614_v20 = vpack.c.bf16 %v951_v17, %v950_v16  ;;  %v725_v22 = vld [vmem:[#allocation10 + $0x18] sm:$0xff]  ;;  %v952_v23 = vld [vmem:[#allocation14 + $0x10] sm:$0xff]  ;;  %p2006_p4 = scmp.ne.s32.totalorder %s2664_s25, %s2005_s10  ;;  %s2214_s2 = smov [#allocation16]  }
 0x122   : > { %1610 = vmatprep.subr.bf16.mxu0 %v2211_v0  ;;  %v953_v24 = vld [vmem:[#allocation14 + $0x18] sm:$0xff]  ;;  %v1599_v25 = vpack.c.bf16 %v725_v22, %v724_v21  ;;  %v718_v27 = vld [vmem:[#allocation8] sm:$0xff]  ;;  %v719_v28 = vld [vmem:[#allocation8 + $0x8] sm:$0xff]  ;;  %v639_v31 = vmul.f32 %v637_v18, %v637_v18  ;;  %s2009_s29 = sshll.u32 %s2214_s2, 4  ;;  %s2010_s29 = int_to_ptr.vmem [resolvable:$false] %s2009_s29 }
 0x123   : > { %v1617_v26 = vpack.c.bf16 %v953_v24, %v952_v23  ;;  %v946_v29 = vld [vmem:[#allocation13] sm:$0xff]  ;;  %v947_v30 = vld [vmem:[#allocation13 + $0x8] sm:$0xff]  ;;  %v1602_v32 = vpack.c.bf16 %v719_v28, %v718_v27  ;;  %v720_v34 = vld [vmem:[#allocation8 + $0x10] sm:$0xff]  ;;  %s2655_s6 = sshll.u32 %s2879_s15, 7  ;;  %p2007_p0 = pnand %p2006_p4, %p2881_p9 }
 0x124   : > { %1594 = vmatpush3.bf16.msra.mxu1 %v1593_v12  ;;  %v1620_v33 = vpack.c.bf16 %v947_v30, %v946_v29  ;;  %v721_v35 = vld [vmem:[#allocation8 + $0x18] sm:$0xff]  ;;  %v948_v36 = vld [vmem:[#allocation13 + $0x10] sm:$0xff]  ;;  %s2662_s11 = scalar_lea.hbm %s2880_s5, %s2655_s6  ;;  %s2011_s12 = scalar_lea.vmem %s2010_s29, 256 }
 0x125   : > { %1612 = vmatpush3.bf16.msra.mxu0 %v1611_v13  ;;  %1595 = vmatprep.subr.bf16.mxu1 %v2211_v0  ;;  %v949_v37 = vld [vmem:[#allocation13 + $0x18] sm:$0xff]  ;;  %v1605_v38 = vpack.c.bf16 %v721_v35, %v720_v34  ;;  %p2008_p7 = pneg %p2007_p0  ;;  %p2012_p11 = scmp.lt.s32.totalorder %s2664_s25, %s2010_s29 }
 0x126   : > { %1613 = vmatprep.subr.bf16.mxu0 %v2211_v0  ;;  %v1623_v39 = vpack.c.bf16 %v949_v37, %v948_v36  ;;  %v638_v40 = vld [vmem:[%s554_s26] sm:$0xff]  ;;  %p2013_p2 = scmp.lt.s32.totalorder %s2011_s12, %s2005_s10 }
 0x127   : > { %1532 = vmatmul.mubr.msk.f32.vlgmr.msra.gmra.mrb[0].mxu1 %vm644_vm1, %v637_v18 }
 0x128   : > { %1597 = vmatpush3.bf16.msra.mxu1 %v1596_v19  ;;  %1565 = vmatmul.mubr.msk.f32.vlgmr.msra.gmra.mrb[0].mxu0 %vm644_vm1, %v637_v18  ;;  %p2014_p10 = por %p2013_p2, %p2012_p11 }
 0x129   : > { %1615 = vmatpush3.bf16.msra.mxu0 %v1614_v20  ;;  %1598 = vmatprep.subr.bf16.mxu1 %v2211_v0 }
 0x12a   : > { %1616 = vmatprep.subr.bf16.mxu0 %v2211_v0  ;;  %1542 = vmatprep.mubr.msk.f32.mxu1 %vm2212_vm0, %v2213_v1  ;;  %p2015_p1 = pnand %p2014_p10, %p2008_p7 }
 0x12b   : > { %1575 = vmatprep.mubr.msk.f32.mxu0 %vm2212_vm0, %v2213_v1 }
 0x12c   : > { %1600 = vmatpush3.bf16.msra.mxu1 %v1599_v25 }
 0x12d   : > { %1618 = vmatpush3.bf16.msra.mxu0 %v1617_v26  ;;  %1601 = vmatprep.subr.bf16.mxu1 %v2211_v0 }
 0x12e   : > { %1619 = vmatprep.subr.bf16.mxu0 %v2211_v0 }
 0x12f   : > { %1543 = vmatmul.mubr.msk.f32.vlgmr.msra.gmra.mrb[2].mxu1 %vm644_vm1, %v639_v31 }
 0x130   : > { %1576 = vmatmul.mubr.msk.f32.vlgmr.msra.gmra.mrb[2].mxu0 %vm644_vm1, %v639_v31  ;;  %1603 = vmatpush3.bf16.msra.mxu1 %v1602_v32 }
 0x131   : > { %1621 = vmatpush3.bf16.msra.mxu0 %v1620_v33  ;;  %1604 = vmatprep.subr.bf16.mxu1 %v2211_v0 }
 0x132   : > { %1622 = vmatprep.subr.bf16.mxu0 %v2211_v0  ;;  %1553 = vmatprep.mubr.msk.f32.mxu1 %vm2212_vm0, %v2213_v1 }
 0x133   : > { %1586 = vmatprep.mubr.msk.f32.mxu0 %vm2212_vm0, %v2213_v1 }
 0x134   : > { %1606 = vmatpush3.bf16.msra.mxu1 %v1605_v38 }
 0x135   : > { %1624 = vmatpush3.bf16.msra.mxu0 %v1623_v39 }
 0x137   : > { %1554 = vmatmul.mubr.msk.f32.vlgmr.msra.gmra.mrb[2].mxu1 %vm644_vm1, %v638_v40 }
 0x138   : > { %1587 = vmatmul.mubr.msk.f32.vlgmr.msra.gmra.mrb[2].mxu0 %vm644_vm1, %v638_v40 }
 0x1fa   : > { %v714_v41 = vpop.f32.mrb[0].mxu1 }
 0x1fb   : > { %1094 = vst.msk [vmem:[%s615_s13] sm:$0xff] %vm644_vm1, %v714_v41  ;;  %v1533_v42 = vpop.f32.mrb[1].mxu1  ;;  %v942_v43 = vpop.f32.mrb[0].mxu0 }
 0x1fc   : > { %1096 = vst.msk [vmem:[%s629_s30] sm:$0xff] %vm644_vm1, %v942_v43  ;;  %v1566_v44 = vpop.f32.mrb[1].mxu0 }
 0x1fd   : > { %2018 = shalt.err (!%p2015_p1)
}
 0x1fe   : > { %s2019_s26 = scalar_lea.hbm %s2662_s11, 128  ;;  %s2023_s28 = scalar_lea.hbm %s2880_s5, 256 }
 0x1ff   : > { %p2020_p5 = scmp.ne.s32.totalorder %s2662_s11, %s2019_s26  ;;  %p2024_p12 = scmp.lt.u32.totalorder %s2662_s11, %s2880_s5 }
 0x200   : > { %p2025_p6 = scmp.lt.u32.totalorder %s2023_s28, %s2019_s26  ;;  %p2027_p4 = scmp.lt.u32.totalorder %s2019_s26, %s2662_s11 }
 0x201   : > { %p2021_p8 = pnand %p2020_p5, %p2881_p9 }
 0x202   : > { %p2026_p13 = por %p2025_p6, %p2024_p12 }
 0x203   : > { %p2022_p3 = pneg %p2021_p8 }
 0x204   : > { %p2028_p0 = por %p2027_p4, %p2026_p13 }
 0x206   : > { %p2029_p7 = pnand %p2028_p0, %p2022_p3 }
 0x208   : > { %2032 = shalt.err (!%p2029_p7)
}
 0x209   : > { %1657 = dma.vmem_to_hbm [thread:$0]  (%p2881_p9), %s2664_s25, 128, %s2662_s11, %s1099_s16  }
 0x20a   : > { %s622_s10 = scalar_lea.vmem [#allocation17], %s2588_s4  ;;  %s1159_s12 = sshll.u32 %s629_s30, 4  ;;  %v868_v45 = vpop.f32.mrb[2].mxu1  ;;  %s2711_s12 = int_to_ptr.vmem [resolvable:$true] %s1159_s12 }
 0x20b   : > { %s1144_s29 = sshll.u32 %s622_s10, 4  ;;  %s2882_s13 = sld [smem:[#allocation40_spill]]  ;;  %1095 = vst.msk [vmem:[%s622_s10] sm:$0xff] %vm644_vm1, %v868_v45  ;;  %v1090_v46 = vpop.f32.mrb[2].mxu0  ;;  %v1555_v47 = vpop.f32.mrb[3].mxu1  ;;  %s2703_s29 = int_to_ptr.vmem [resolvable:$true] %s1144_s29 }
 0x20c   : > { %s636_s14 = scalar_lea.vmem [#allocation20], %s2588_s4  ;;  %s2883_s1 = sld [smem:[#allocation41_spill]]  ;;  %v1588_v48 = vpop.f32.mrb[3].mxu0 }
 0x20d   : > { %s1174_s2 = sshll.u32 %s636_s14, 4  ;;  %s2884_s30 = sld [smem:[#allocation42_spill]]  ;;  %1097 = vst.msk [vmem:[%s636_s14] sm:$0xff] %vm644_vm1, %v1090_v46  ;;  %s2720_s2 = int_to_ptr.vmem [resolvable:$true] %s1174_s2 }
 0x20e   : > { %s2885_s0 = sand.u32 1, %s2309_s23   ;;  %s2033_s26 = scalar_lea.vmem %s2703_s29, 128 }
 0x20f   : > { %s2725_s24 = scalar_lea.sflag [#allocation18], %s2885_s0  ;;  %p2034_p11 = scmp.ne.s32.totalorder %s2703_s29, %s2033_s26 }
 0x210   : > { %s2215_s10 = smov [#allocation17]  }
 0x211   : > { %s2700_s28 = scalar_lea.hbm %s2882_s13, %s2655_s6  ;;  %p2035_p2 = pnand %p2034_p11, %p2881_p9 }
 0x212   : > { %s2709_s25 = scalar_lea.hbm %s2883_s1, %s2655_s6  ;;  %s2037_s15 = sshll.u32 %s2215_s10, 4  ;;  %s2038_s15 = int_to_ptr.vmem [resolvable:$false] %s2037_s15 }
 0x213   : > { %s2718_s16 = scalar_lea.hbm %s2884_s30, %s2655_s6  ;;  %p2036_p10 = pneg %p2035_p2 }
 0x214   : > { %s2039_s5 = scalar_lea.vmem %s2038_s15, 256  ;;  %p2040_p1 = scmp.lt.s32.totalorder %s2703_s29, %s2038_s15 }
 0x215   : > { %p2041_p5 = scmp.lt.s32.totalorder %s2039_s5, %s2033_s26 }
 0x217   : > { %p2042_p8 = por %p2041_p5, %p2040_p1 }
 0x219   : > { %p2043_p3 = pnand %p2042_p8, %p2036_p10 }
 0x21b   : > { %2046 = shalt.err (!%p2043_p3)
}
 0x21c   : > { %s2047_s23 = scalar_lea.hbm %s2700_s28, 128  ;;  %s2051_s4 = scalar_lea.hbm %s2882_s13, 256 }
 0x21d   : > { %p2048_p12 = scmp.ne.s32.totalorder %s2700_s28, %s2047_s23  ;;  %p2052_p4 = scmp.lt.u32.totalorder %s2700_s28, %s2882_s13 }
 0x21e   : > { %p2053_p0 = scmp.lt.u32.totalorder %s2051_s4, %s2047_s23  ;;  %p2055_p11 = scmp.lt.u32.totalorder %s2047_s23, %s2700_s28 }
 0x21f   : > { %p2049_p6 = pnand %p2048_p12, %p2881_p9 }
 0x220   : > { %p2054_p7 = por %p2053_p0, %p2052_p4 }
 0x221   : > { %p2050_p13 = pneg %p2049_p6 }
 0x222   : > { %p2056_p2 = por %p2055_p11, %p2054_p7 }
 0x224   : > { %p2057_p10 = pnand %p2056_p2, %p2050_p13 }
 0x226   : > { %2060 = shalt.err (!%p2057_p10)
}
 0x227   : > { %1658 = dma.vmem_to_hbm [thread:$0]  (%p2881_p9), %s2703_s29, 128, %s2700_s28, %s2725_s24  }
 0x228   : > { %s2061_s5 = scalar_lea.vmem %s2711_s12, 128  ;;  %s2216_s26 = smov [#allocation19]  }
 0x229   : > { %p2062_p1 = scmp.ne.s32.totalorder %s2711_s12, %s2061_s5  ;;  %s2065_s10 = sshll.u32 %s2216_s26, 4  ;;  %s2066_s10 = int_to_ptr.vmem [resolvable:$false] %s2065_s10 }
 0x22a   : > { %s2067_s15 = scalar_lea.vmem %s2066_s10, 256  ;;  %p2068_p3 = scmp.lt.s32.totalorder %s2711_s12, %s2066_s10 }
 0x22b   : > { %p2063_p5 = pnand %p2062_p1, %p2881_p9  ;;  %p2069_p12 = scmp.lt.s32.totalorder %s2067_s15, %s2061_s5 }
 0x22d   : > { %p2064_p8 = pneg %p2063_p5  ;;  %p2070_p6 = por %p2069_p12, %p2068_p3 }
 0x22f   : > { %p2071_p13 = pnand %p2070_p6, %p2064_p8 }
 0x231   : > { %2074 = shalt.err (!%p2071_p13)
}
 0x232   : > { %s2075_s29 = scalar_lea.hbm %s2709_s25, 128  ;;  %s2079_s6 = scalar_lea.hbm %s2883_s1, 256 }
 0x233   : > { %p2076_p4 = scmp.ne.s32.totalorder %s2709_s25, %s2075_s29  ;;  %p2080_p11 = scmp.lt.u32.totalorder %s2709_s25, %s2883_s1 }
 0x234   : > { %p2081_p2 = scmp.lt.u32.totalorder %s2079_s6, %s2075_s29  ;;  %p2083_p1 = scmp.lt.u32.totalorder %s2075_s29, %s2709_s25 }
 0x235   : > { %p2077_p0 = pnand %p2076_p4, %p2881_p9 }
 0x236   : > { %p2082_p10 = por %p2081_p2, %p2080_p11 }
 0x237   : > { %p2078_p7 = pneg %p2077_p0 }
 0x238   : > { %p2084_p5 = por %p2083_p1, %p2082_p10 }
 0x23a   : > { %p2085_p8 = pnand %p2084_p5, %p2078_p7 }
 0x23c   : > { %2088 = shalt.err (!%p2085_p8)
}
 0x23d   : > { %1659 = dma.vmem_to_hbm [thread:$0]  (%p2881_p9), %s2711_s12, 128, %s2709_s25, %s2725_s24  }
 0x23e   : > { %s1114_s11 = scalar_lea.sflag [#allocation21], %s2585_s3  ;;  %s2089_s0 = scalar_lea.vmem %s2720_s2, 128 }
 0x23f   : > { %p2090_p3 = scmp.ne.s32.totalorder %s2720_s2, %s2089_s0  ;;  %s2217_s5 = smov [#allocation20]  }
 0x240   : > { %s2093_s26 = sshll.u32 %s2217_s5, 4  ;;  %s2094_s26 = int_to_ptr.vmem [resolvable:$false] %s2093_s26 }
 0x241   : > { %p2091_p12 = pnand %p2090_p3, %p2881_p9  ;;  %s2095_s10 = scalar_lea.vmem %s2094_s26, 256 }
 0x242   : > { %p2096_p13 = scmp.lt.s32.totalorder %s2720_s2, %s2094_s26  ;;  %p2097_p4 = scmp.lt.s32.totalorder %s2095_s10, %s2089_s0 }
 0x243   : > { %p2092_p6 = pneg %p2091_p12 }
 0x244   : > { %p2098_p0 = por %p2097_p4, %p2096_p13 }
 0x246   : > { %p2099_p7 = pnand %p2098_p0, %p2092_p6 }
 0x248   : > { %2102 = shalt.err (!%p2099_p7)
}
 0x249   : > { %s2103_s3 = scalar_lea.hbm %s2718_s16, 128  ;;  %s2107_s24 = scalar_lea.hbm %s2884_s30, 256 }
 0x24a   : > { %p2104_p11 = scmp.ne.s32.totalorder %s2718_s16, %s2103_s3  ;;  %p2108_p1 = scmp.lt.u32.totalorder %s2718_s16, %s2884_s30 }
 0x24b   : > { %p2109_p5 = scmp.lt.u32.totalorder %s2107_s24, %s2103_s3  ;;  %p2111_p3 = scmp.lt.u32.totalorder %s2103_s3, %s2718_s16 }
 0x24c   : > { %p2105_p2 = pnand %p2104_p11, %p2881_p9 }
 0x24d   : > { %p2110_p8 = por %p2109_p5, %p2108_p1 }
 0x24e   : > { %p2106_p10 = pneg %p2105_p2 }
 0x24f   : > { %p2112_p12 = por %p2111_p3, %p2110_p8 }
 0x251   : > { %p2113_p6 = pnand %p2112_p12, %p2106_p10 }
 0x253   : > { %2116 = shalt.err (!%p2113_p6)
}
 0x254   : > { %1660 = dma.vmem_to_hbm [thread:$0]  (%p2881_p9), %s2720_s2, 128, %s2718_s16, %s1114_s11  }
 0x255 PF: > { %s1186_s28 = sand.u32 1, %s2179_s17   ;;  %p2886_p13 = scmp.ne.s32.totalorder %s2865_s20, 0 }
 0x256   : > { %p2887_p4 = scmp.ge.s32.totalorder %s2199_s22, 2  ;;  %s1187_s23 = scalar_lea.sflag [#allocation4], %s1186_s28 }
 0x258   : > { %p1692_p0 = pnand %p2887_p4, %p2886_p13 }
 0x25a   : > { %2166 = dma.done.wait (!%p1692_p0), %s1187_s23, 128  }
 0x25b   : > { %2168 = vsyncadd (!%p1692_p0), %s1187_s23, 4294967168  ;;  %s2888_s6 = sadd.s32 4294967294, %s2199_s22  }
 0x25c   : > { %s1195_s14 = sand.u32 1, %s2888_s6  }
 0x25d   : > { %s1196_s4 = scalar_lea.sflag [#allocation18], %s1195_s14 }
 0x25e   : > { %2170 = dma.done.wait (!%p1692_p0), %s1196_s4, 256  }
 0x25f   : > { %2172 = vsyncadd (!%p1692_p0), %s1196_s4, 4294967040  ;;  %s1214_s8 = scalar_lea.sflag [#allocation21], %s1186_s28 }
 0x260   : > { %2174 = dma.done.wait (!%p1692_p0), %s1214_s8, 128  }
 0x261   : > { %2176 = vsyncadd (!%p1692_p0), %s1214_s8, 4294967168  ;;  %s40_s22 = sadd.s32 1, %s2199_s22   ;;  %s2889_s17 = smov %s2183_s18 }
 0x262   : > { %p37_p9 = scmp.ge.s32.totalorder %s40_s22, 4   ;;  %s2890_s18 = smov %s2187_s19 }
 0x263   : > { %s2891_s19 = smov %s2506_s9  ;;  %s2892_s20 = smov %s2195_s21 }
 0x264   : > { %s2893_s21 = smov %s2895_s27  ;;  %39 = sbr.rel (!%p37_p9) target bundleno = 27 (0x1b), region = 189 }
 0x26b   :  { %1219 = vsyncpa [#allocation3], 1 }
 0x26c   :  { %1221 = vsyncpa [#allocation3 + $0x1], 1 }
 0x26d   :  { %1222 = vsyncpa [#allocation6], 1 }
 0x26e   :  { %1224 = vsyncpa [#allocation6 + $0x1], 1 }
 0x26f   :  { %1225 = vsyncpa [#allocation9], 1 }
 0x270   :  { %1226 = vsyncpa [#allocation12], 1 }
 0x271   :  { %1227 = vsyncpa [#allocation15], 1 }
 0x272   :  { %1228 = vsyncpa [#allocation4], 1 }
 0x273   :  { %1230 = vsyncpa [#allocation4 + $0x1], 1 }
 0x274   :  { %1231 = vsyncpa [#allocation18], 1 }
 0x275   :  { %1233 = vsyncpa [#allocation18 + $0x1], 1 }
 0x276   :  { %1234 = vsyncpa [#allocation21], 1 }
 0x277   :  { %1236 = vsyncpa [#allocation21 + $0x1], 1 }

</bundles_post_ra>
